<compile_context>
chip_gen: v7x
topology: tpu7x:2x2x1
jax: 0.10.0
libtpu: 0.0.40
codegen_flags: <defaults>
</compile_context>

<pallas_src>
import functools

import jax
import jax.numpy as jnp
from jax import lax
from jax.experimental import pallas as pl
from jax.experimental.pallas import tpu as pltpu

N_HIDDEN = 32
N_LATENT = 8


def _round_up(n, m):
    return -(-n // m) * m


def _omni_kernel(x_ref, eps_ref, slab_ref, prelu_ref, out_ref, *,
                 win, bsp, feats, layout, out_w):
    H = N_HIDDEN
    L = N_LATENT
    N = win * bsp

    def w(name):
        r0, nr, nc = layout[name]
        return slab_ref[r0:r0 + nr, 0:nc]

    def mm(a, wt, b):
        # DEFAULT precision: single MXU pass; accumulate in f32.
        return jnp.dot(a, wt, preferred_element_type=jnp.float32) + b

    def prelu(v, a):
        return jnp.where(v >= 0.0, v, a * v)

    # PReLU slopes live in SMEM (scalars): enc1, enc2, dec1, dec2.
    a_e1 = prelu_ref[0]
    a_e2 = prelu_ref[1]
    a_d1 = prelu_ref[2]
    a_d2 = prelu_ref[3]

    # Recurrent weights / biases (loaded once, off the serial path).
    whh_bd = w("whh_bd")            # (2H, 6H) block-diag [whh0 ; whh1]
    wih1 = w("wih1")                # (H, 3H)
    bias1_i = w("bias1_i")          # (1, 3H): [bih1_rz + bhh1_rz | bih1_n]
    bhh0_n = w("bhh0_n")            # (1, H)
    bhh1_n = w("bhh1_n")            # (1, H)

    # Hoisted layer-0 input projection for ALL timesteps (rz biases folded in).
    gi0_all = mm(x_ref[...], w("wih0"), w("bias0_i"))          # (win*bsp, 3H)

    def gru_update(gi, gh, h, bhh_n):
        # PyTorch gate order along the fused 3H axis: r, z, n.
        rz = jax.nn.sigmoid(gi[:, :2 * H] + gh[:, :2 * H])     # one EUP push
        r = rz[:, :H]
        z = rz[:, H:]
        n = jnp.tanh(gi[:, 2 * H:] + r * (gh[:, 2 * H:] + bhh_n))
        return (1.0 - z) * n + z * h

    h0 = jnp.zeros((bsp, H), jnp.float32)
    h1 = jnp.zeros((bsp, H), jnp.float32)
    outs = []
    # Fully-unrolled serial recurrence (win is small & static).  Two serial
    # MXU round-trips per step; per-step h1 kept in vregs.
    for t in range(win):
        gh = jnp.dot(jnp.concatenate([h0, h1], axis=1), whh_bd,
                     preferred_element_type=jnp.float32)       # (bsp, 6H)
        gi0 = gi0_all[t * bsp:(t + 1) * bsp, :]                # 8-row aligned
        h0 = gru_update(gi0, gh[:, :3 * H], h0, bhh0_n)
        gi1 = mm(h0, wih1, bias1_i)
        h1 = gru_update(gi1, gh[:, 3 * H:], h1, bhh1_n)
        outs.append(h1)

    hs = jnp.concatenate(outs, axis=0)                         # (N, H) time-major

    # ---- batched encoder / VAE reparameterization / decoder ----
    e1 = prelu(mm(hs, w("we1"), w("be1")), a_e1)
    e2 = prelu(mm(e1, w("we2"), w("be2")), a_e2)
    muvar = mm(e2, w("we3"), w("be3"))                         # (N, 2L) [mu|logvar]
    mu = muvar[:, :L]
    lv = muvar[:, L:]
    zlat = mu + eps_ref[...] * jnp.exp(0.5 * lv)               # reparameterize
    d1 = prelu(mm(zlat, w("wd1"), w("bd1")), a_d1)
    d2 = prelu(mm(d1, w("wd2"), w("bd2")), a_d2)
    rec = jax.nn.sigmoid(mm(d2, w("wd3"), w("bd3")))           # (N, feats)

    # Single lane-dense store: columns [recon | mu|logvar | hidden | zero pad].
    hid = jnp.concatenate([h0, h1], axis=0)                    # (2*bsp, H)
    if N > 2 * bsp:
        hid = jnp.concatenate(
            [hid, jnp.zeros((N - 2 * bsp, H), jnp.float32)], axis=0)
    pieces = [rec, muvar, hid]
    used = feats + 2 * L + H
    if out_w > used:
        pieces.append(jnp.zeros((N, out_w - used), jnp.float32))
    out_ref[...] = jnp.concatenate(pieces, axis=1)


def _pack_weights(params):
    """Pack every weight/bias into one lane-dense (rows, 6H) f32 slab.

    Returns (slab, layout) with layout[name] = (row_offset, n_rows, n_cols);
    all row offsets are multiples of 8 (sublane-tile aligned).  GRU r/z biases
    are pre-folded (bih_rz + bhh_rz); the hidden n-gate biases stay separate
    because PyTorch applies them inside r * (W_hn h + b_hn).
    """
    H = N_HIDDEN
    W = 6 * H

    whh_bd = jnp.zeros((2 * H, 6 * H), jnp.float32)
    whh_bd = whh_bd.at[:H, :3 * H].set(params["whh0"])
    whh_bd = whh_bd.at[H:, 3 * H:].set(params["whh1"])

    def fold(bih, bhh):
        return jnp.concatenate(
            [bih[:, :2 * H] + bhh[:, :2 * H], bih[:, 2 * H:]], axis=1)

    entries = [
        ("wih0", params["wih0"]),
        ("whh_bd", whh_bd),
        ("wih1", params["wih1"]),
        ("we1", params["we1"]), ("we2", params["we2"]), ("we3", params["we3"]),
        ("wd1", params["wd1"]), ("wd2", params["wd2"]), ("wd3", params["wd3"]),
        ("bias0_i", fold(params["bih0"], params["bhh0"])),
        ("bhh0_n", params["bhh0"][:, 2 * H:]),
        ("bias1_i", fold(params["bih1"], params["bhh1"])),
        ("bhh1_n", params["bhh1"][:, 2 * H:]),
        ("be1", params["be1"]), ("be2", params["be2"]), ("be3", params["be3"]),
        ("bd1", params["bd1"]), ("bd2", params["bd2"]), ("bd3", params["bd3"]),
    ]

    layout = {}
    blocks = []
    row = 0
    for name, arr in entries:
        r, c = arr.shape
        rp = _round_up(r, 8)
        blocks.append(jnp.zeros((rp, W), jnp.float32).at[:r, :c].set(arr))
        layout[name] = (row, r, c)
        row += rp
    return jnp.concatenate(blocks, axis=0), layout


def init_params(key, feats):
    """Deterministic parameter init; GRU weights stored transposed + gate-fused."""
    ks = iter(jax.random.split(key, 24))
    H, L = N_HIDDEN, N_LATENT

    def u(shape, fan_in):
        bound = 1.0 / float(fan_in) ** 0.5
        return jax.random.uniform(next(ks), shape, jnp.float32, -bound, bound)

    p = {}
    # GRU: torch weight_ih_l0 is (3H, in) rows [r; z; n]; stored here as the
    # transpose (in, 3H) with columns [r | z | n].
    p["wih0"] = u((feats, 3 * H), H)
    p["whh0"] = u((H, 3 * H), H)
    p["bih0"] = u((1, 3 * H), H)
    p["bhh0"] = u((1, 3 * H), H)
    p["wih1"] = u((H, 3 * H), H)
    p["whh1"] = u((H, 3 * H), H)
    p["bih1"] = u((1, 3 * H), H)
    p["bhh1"] = u((1, 3 * H), H)
    # Encoder (weights stored (in, out) == torch W.T); last Linear fused as
    # (H, 2L) with columns [mu | logvar].
    p["we1"] = u((H, H), H)
    p["be1"] = u((1, H), H)
    p["we2"] = u((H, H), H)
    p["be2"] = u((1, H), H)
    p["we3"] = u((H, 2 * L), H)
    p["be3"] = u((1, 2 * L), H)
    # Decoder
    p["wd1"] = u((L, H), L)
    p["bd1"] = u((1, H), L)
    p["wd2"] = u((H, H), H)
    p["bd2"] = u((1, H), H)
    p["wd3"] = u((H, feats), H)
    p["bd3"] = u((1, feats), H)
    # PReLU slopes (PyTorch default init 0.25): enc1, enc2, dec1, dec2.
    p["prelu"] = jnp.full((4,), 0.25, jnp.float32)
    return p


@jax.jit
def omni_anomaly_forward(x, params, eps):
    """x: (bs, win, feats), eps: (win, bs, latent).  Torch-style outputs."""
    bs, win, feats = x.shape
    H, L = N_HIDDEN, N_LATENT
    assert win >= 2, "window must be >= 2"

    bsp = _round_up(bs, 8)                         # pad batch to a sublane tile
    out_w = _round_up(feats + 2 * L + H, 128)      # lane-dense output width
    n = win * bsp

    # torch: x.view(-1, bs, n_feats) -> time-major flat reinterpretation.
    x_tm = jnp.reshape(x, (win, bs, feats))
    x_pad = jnp.zeros((win, bsp, feats), jnp.float32).at[:, :bs, :].set(x_tm)
    eps_pad = jnp.zeros((win, bsp, L), jnp.float32).at[:, :bs, :].set(eps)

    slab, layout = _pack_weights(params)

    kernel = functools.partial(_omni_kernel, win=win, bsp=bsp, feats=feats,
                               layout=layout, out_w=out_w)
    vmem = pl.BlockSpec(memory_space=pltpu.MemorySpace.VMEM)
    smem = pl.BlockSpec(memory_space=pltpu.MemorySpace.SMEM)

    # Advisory cost estimate for XLA scheduling around the custom call.
    flops = 2 * (n * feats * 3 * H
                 + win * bsp * (2 * H * 6 * H + H * 3 * H)
                 + n * (H * H + H * H + H * 2 * L
                        + L * H + H * H + H * feats))
    transcendentals = n * (6 * H + L + feats)
    bytes_accessed = 4 * (n * (feats + L) + int(slab.size) + 4 + n * out_w)

    out = pl.pallas_call(
        kernel,
        out_shape=jax.ShapeDtypeStruct((n, out_w), jnp.float32),
        in_specs=[vmem, vmem, vmem, smem],
        out_specs=vmem,
        cost_estimate=pl.CostEstimate(flops=flops,
                                      transcendentals=transcendentals,
                                      bytes_accessed=bytes_accessed),
    )(x_pad.reshape(n, feats), eps_pad.reshape(n, L), slab, params["prelu"])

    # Split the packed output slab (drop padded batch rows first).
    out3 = out.reshape(win, bsp, out_w)
    rec_tm = out3[:, :bs, :feats]                              # (win, bs, feats)
    mu_tm = out3[:, :bs, feats:feats + L]
    lv_tm = out3[:, :bs, feats + L:feats + 2 * L]
    c0 = feats + 2 * L
    hidden = jnp.stack([out[0:bs, c0:c0 + H],
                        out[bsp:bsp + bs, c0:c0 + H]], axis=0)  # (2, bs, H)

    # torch's flat .reshape of the time-major tensors.
    return (rec_tm.reshape(bs, win * feats),
            mu_tm.reshape(bs, win * L),
            lv_tm.reshape(bs, win * L),
            hidden)


def _reference_forward(x, params, eps):
    """Pure-JAX reference mirroring the PyTorch forward (hidden=None path).

    Per-gate (unfused) GRU matmuls in HIGHEST f32 precision: a structural and
    numeric ground truth for the fused, DEFAULT-precision kernel.
    """
    bs, win, feats = x.shape
    H, L = N_HIDDEN, N_LATENT
    hp = lax.Precision.HIGHEST
    d = lambda a, b: jnp.dot(a, b, precision=hp)
    prelu = lambda v, a: jnp.where(v >= 0, v, a * v)
    p = params

    xs = jnp.reshape(x, (win, bs, feats))

    def gru_cell(x_t, h, wih, whh, bih, bhh):
        r = jax.nn.sigmoid(d(x_t, wih[:, :H]) + bih[:, :H]
                           + d(h, whh[:, :H]) + bhh[:, :H])
        z = jax.nn.sigmoid(d(x_t, wih[:, H:2 * H]) + bih[:, H:2 * H]
                           + d(h, whh[:, H:2 * H]) + bhh[:, H:2 * H])
        n = jnp.tanh(d(x_t, wih[:, 2 * H:]) + bih[:, 2 * H:]
                     + r * (d(h, whh[:, 2 * H:]) + bhh[:, 2 * H:]))
        return (1.0 - z) * n + z * h

    h0 = jnp.zeros((bs, H), jnp.float32)
    h1 = jnp.zeros((bs, H), jnp.float32)
    outs = []
    for t in range(win):
        h0 = gru_cell(xs[t], h0, p["wih0"], p["whh0"], p["bih0"], p["bhh0"])
        h1 = gru_cell(h0, h1, p["wih1"], p["whh1"], p["bih1"], p["bhh1"])
        outs.append(h1)
    out = jnp.stack(outs, 0)                                    # (win, bs, H)

    a = p["prelu"]
    e1 = prelu(d(out, p["we1"]) + p["be1"], a[0])
    e2 = prelu(d(e1, p["we2"]) + p["be2"], a[1])
    enc = d(e2, p["we3"]) + p["be3"]                            # (win, bs, 2L)
    mu, lv = enc[..., :L], enc[..., L:]
    z = mu + eps * jnp.exp(0.5 * lv)
    d1 = prelu(d(z, p["wd1"]) + p["bd1"], a[2])
    d2 = prelu(d(d1, p["wd2"]) + p["bd2"], a[3])
    rec = jax.nn.sigmoid(d(d2, p["wd3"]) + p["bd3"])
    hidden = jnp.stack([h0, h1], 0)
    return (rec.reshape(bs, win * feats),
            mu.reshape(bs, win * L),
            lv.reshape(bs, win * L),
            hidden)


if __name__ == "__main__":
    key = jax.random.PRNGKey(0)
    bs, win, feats = 2, 8, 4
    kx, kp, ke = jax.random.split(key, 3)

    x = jax.random.uniform(kx, (bs, win, feats), jnp.float32)
    params = init_params(kp, feats)
    # TODO(synk): torch draws eps = randn_like(std) inside forward; here the
    # reparameterization noise is generated host-side and passed in.
    eps = jax.random.normal(ke, (win, bs, N_LATENT), jnp.float32)

    outs = omni_anomaly_forward(x, params, eps)
    outs = jax.block_until_ready(outs)

    refs = _reference_forward(x, params, eps)
    # Kernel matmuls run at DEFAULT (single-pass) MXU precision while the
    # reference is HIGHEST-precision f32, so the tolerance covers bf16 operand
    # truncation accumulated through the recurrence (~1e-2); structural bugs
    # (gate order, slab offsets, output permutation) produce errors >> 0.1.
    for name, o, r in zip(["recon", "mu", "logvar", "hidden"], outs, refs):
        assert o.shape == r.shape, f"shape mismatch for {name}"
        assert jnp.allclose(o, r, atol=5e-2, rtol=5e-2), \
            f"mismatch vs reference: {name}"

    print("KERNEL_OK")
</pallas_src>

<mosaic_0001>
module attributes {stable_mosaic.version = 11 : i64} {
  func.func @_omni_kernel(%arg0: memref<64x4xf32, #tpu.memory_space<vmem>>, %arg1: memref<64x8xf32, #tpu.memory_space<vmem>>, %arg2: memref<352x192xf32, #tpu.memory_space<vmem>>, %arg3: memref<4xf32, #tpu.memory_space<smem>>, %arg4: memref<64x128xf32, #tpu.memory_space<vmem>>) attributes {dimension_semantics = [], scalar_prefetch = 0 : i64, scratch_operands = 0 : i64, tpu.core_type = #tpu.core_type<tc>} {
    %c0 = arith.constant 0 : index
    %0 = memref.load %arg3[%c0] : memref<4xf32, #tpu.memory_space<smem>>
    %c1 = arith.constant 1 : index
    %1 = memref.load %arg3[%c1] : memref<4xf32, #tpu.memory_space<smem>>
    %c2 = arith.constant 2 : index
    %2 = memref.load %arg3[%c2] : memref<4xf32, #tpu.memory_space<smem>>
    %c3 = arith.constant 3 : index
    %3 = memref.load %arg3[%c3] : memref<4xf32, #tpu.memory_space<smem>>
    %c8 = arith.constant 8 : index
    %c0_0 = arith.constant 0 : index
    %4 = vector.load %arg2[%c8, %c0_0] : memref<352x192xf32, #tpu.memory_space<vmem>>, vector<64x192xf32>
    %c72 = arith.constant 72 : index
    %c0_1 = arith.constant 0 : index
    %5 = vector.load %arg2[%c72, %c0_1] : memref<352x192xf32, #tpu.memory_space<vmem>>, vector<32x96xf32>
    %c288 = arith.constant 288 : index
    %c0_2 = arith.constant 0 : index
    %6 = vector.load %arg2[%c288, %c0_2] : memref<352x192xf32, #tpu.memory_space<vmem>>, vector<1x96xf32>
    %c280 = arith.constant 280 : index
    %c0_3 = arith.constant 0 : index
    %7 = vector.load %arg2[%c280, %c0_3] : memref<352x192xf32, #tpu.memory_space<vmem>>, vector<1x32xf32>
    %c296 = arith.constant 296 : index
    %c0_4 = arith.constant 0 : index
    %8 = vector.load %arg2[%c296, %c0_4] : memref<352x192xf32, #tpu.memory_space<vmem>>, vector<1x32xf32>
    %c0_5 = arith.constant 0 : index
    %c0_6 = arith.constant 0 : index
    %9 = vector.load %arg0[%c0_5, %c0_6] : memref<64x4xf32, #tpu.memory_space<vmem>>, vector<64x4xf32>
    %c0_7 = arith.constant 0 : index
    %c0_8 = arith.constant 0 : index
    %10 = vector.load %arg2[%c0_7, %c0_8] : memref<352x192xf32, #tpu.memory_space<vmem>>, vector<4x96xf32>
    %c272 = arith.constant 272 : index
    %c0_9 = arith.constant 0 : index
    %11 = vector.load %arg2[%c272, %c0_9] : memref<352x192xf32, #tpu.memory_space<vmem>>, vector<1x96xf32>
    %cst = arith.constant dense<0.000000e+00> : vector<64x96xf32>
    %12 = tpu.matmul %9, %10, %cst {dimension_numbers = #tpu.dot_dimension_numbers<[1], [0], [0], [1], [0, 0, 1, 1], [], []>} : vector<64x4xf32>, vector<4x96xf32>, vector<64x96xf32> -> vector<64x96xf32>
    %13 = vector.broadcast %11 : vector<1x96xf32> to vector<64x96xf32>
    %14 = arith.addf %12, %13 : vector<64x96xf32>
    %cst_10 = arith.constant 0.000000e+00 : f32
    %15 = vector.broadcast %cst_10 : f32 to vector<8x32xf32>
    %cst_11 = arith.constant 0.000000e+00 : f32
    %16 = vector.broadcast %cst_11 : f32 to vector<8x32xf32>
    %17 = tpu.concatenate %15, %16 in 1 : vector<8x32xf32>, vector<8x32xf32> -> vector<8x64xf32>
    %cst_12 = arith.constant dense<0.000000e+00> : vector<8x192xf32>
    %18 = tpu.matmul %17, %4, %cst_12 {dimension_numbers = #tpu.dot_dimension_numbers<[1], [0], [0], [1], [0, 0, 1, 1], [], []>} : vector<8x64xf32>, vector<64x192xf32>, vector<8x192xf32> -> vector<8x192xf32>
    %19 = vector.extract_strided_slice %14 {offsets = [0, 0], sizes = [8, 96], strides = [1, 1]} : vector<64x96xf32> to vector<8x96xf32>
    %20 = vector.extract_strided_slice %18 {offsets = [0, 0], sizes = [8, 96], strides = [1, 1]} : vector<8x192xf32> to vector<8x96xf32>
    %21 = vector.extract_strided_slice %19 {offsets = [0, 0], sizes = [8, 64], strides = [1, 1]} : vector<8x96xf32> to vector<8x64xf32>
    %22 = vector.extract_strided_slice %20 {offsets = [0, 0], sizes = [8, 64], strides = [1, 1]} : vector<8x96xf32> to vector<8x64xf32>
    %23 = arith.addf %21, %22 : vector<8x64xf32>
    %24 = arith.negf %23 : vector<8x64xf32>
    %25 = math.exp %24 : vector<8x64xf32>
    %cst_13 = arith.constant 1.000000e+00 : f32
    %26 = vector.broadcast %cst_13 : f32 to vector<8x64xf32>
    %27 = arith.addf %26, %25 : vector<8x64xf32>
    %28 = arith.divf %26, %27 : vector<8x64xf32>
    %29 = vector.extract_strided_slice %28 {offsets = [0, 0], sizes = [8, 32], strides = [1, 1]} : vector<8x64xf32> to vector<8x32xf32>
    %30 = vector.extract_strided_slice %28 {offsets = [0, 32], sizes = [8, 32], strides = [1, 1]} : vector<8x64xf32> to vector<8x32xf32>
    %31 = vector.extract_strided_slice %19 {offsets = [0, 64], sizes = [8, 32], strides = [1, 1]} : vector<8x96xf32> to vector<8x32xf32>
    %32 = vector.extract_strided_slice %20 {offsets = [0, 64], sizes = [8, 32], strides = [1, 1]} : vector<8x96xf32> to vector<8x32xf32>
    %33 = vector.broadcast %7 : vector<1x32xf32> to vector<8x32xf32>
    %34 = arith.addf %32, %33 : vector<8x32xf32>
    %35 = arith.mulf %29, %34 : vector<8x32xf32>
    %36 = arith.addf %31, %35 : vector<8x32xf32>
    %37 = math.tanh %36 : vector<8x32xf32>
    %cst_14 = arith.constant 1.000000e+00 : f32
    %38 = vector.broadcast %cst_14 : f32 to vector<8x32xf32>
    %39 = arith.subf %38, %30 : vector<8x32xf32>
    %40 = arith.mulf %39, %37 : vector<8x32xf32>
    %41 = arith.mulf %30, %15 : vector<8x32xf32>
    %42 = arith.addf %40, %41 : vector<8x32xf32>
    %cst_15 = arith.constant dense<0.000000e+00> : vector<8x96xf32>
    %43 = tpu.matmul %42, %5, %cst_15 {dimension_numbers = #tpu.dot_dimension_numbers<[1], [0], [0], [1], [0, 0, 1, 1], [], []>} : vector<8x32xf32>, vector<32x96xf32>, vector<8x96xf32> -> vector<8x96xf32>
    %44 = vector.broadcast %6 : vector<1x96xf32> to vector<8x96xf32>
    %45 = arith.addf %43, %44 : vector<8x96xf32>
    %46 = vector.extract_strided_slice %18 {offsets = [0, 96], sizes = [8, 96], strides = [1, 1]} : vector<8x192xf32> to vector<8x96xf32>
    %47 = vector.extract_strided_slice %45 {offsets = [0, 0], sizes = [8, 64], strides = [1, 1]} : vector<8x96xf32> to vector<8x64xf32>
    %48 = vector.extract_strided_slice %46 {offsets = [0, 0], sizes = [8, 64], strides = [1, 1]} : vector<8x96xf32> to vector<8x64xf32>
    %49 = arith.addf %47, %48 : vector<8x64xf32>
    %50 = arith.negf %49 : vector<8x64xf32>
    %51 = math.exp %50 : vector<8x64xf32>
    %cst_16 = arith.constant 1.000000e+00 : f32
    %52 = vector.broadcast %cst_16 : f32 to vector<8x64xf32>
    %53 = arith.addf %52, %51 : vector<8x64xf32>
    %54 = arith.divf %52, %53 : vector<8x64xf32>
    %55 = vector.extract_strided_slice %54 {offsets = [0, 0], sizes = [8, 32], strides = [1, 1]} : vector<8x64xf32> to vector<8x32xf32>
    %56 = vector.extract_strided_slice %54 {offsets = [0, 32], sizes = [8, 32], strides = [1, 1]} : vector<8x64xf32> to vector<8x32xf32>
    %57 = vector.extract_strided_slice %45 {offsets = [0, 64], sizes = [8, 32], strides = [1, 1]} : vector<8x96xf32> to vector<8x32xf32>
    %58 = vector.extract_strided_slice %46 {offsets = [0, 64], sizes = [8, 32], strides = [1, 1]} : vector<8x96xf32> to vector<8x32xf32>
    %59 = vector.broadcast %8 : vector<1x32xf32> to vector<8x32xf32>
    %60 = arith.addf %58, %59 : vector<8x32xf32>
    %61 = arith.mulf %55, %60 : vector<8x32xf32>
    %62 = arith.addf %57, %61 : vector<8x32xf32>
    %63 = math.tanh %62 : vector<8x32xf32>
    %cst_17 = arith.constant 1.000000e+00 : f32
    %64 = vector.broadcast %cst_17 : f32 to vector<8x32xf32>
    %65 = arith.subf %64, %56 : vector<8x32xf32>
    %66 = arith.mulf %65, %63 : vector<8x32xf32>
    %67 = arith.mulf %56, %16 : vector<8x32xf32>
    %68 = arith.addf %66, %67 : vector<8x32xf32>
    %69 = tpu.concatenate %42, %68 in 1 : vector<8x32xf32>, vector<8x32xf32> -> vector<8x64xf32>
    %cst_18 = arith.constant dense<0.000000e+00> : vector<8x192xf32>
    %70 = tpu.matmul %69, %4, %cst_18 {dimension_numbers = #tpu.dot_dimension_numbers<[1], [0], [0], [1], [0, 0, 1, 1], [], []>} : vector<8x64xf32>, vector<64x192xf32>, vector<8x192xf32> -> vector<8x192xf32>
    %71 = vector.extract_strided_slice %14 {offsets = [8, 0], sizes = [8, 96], strides = [1, 1]} : vector<64x96xf32> to vector<8x96xf32>
    %72 = vector.extract_strided_slice %70 {offsets = [0, 0], sizes = [8, 96], strides = [1, 1]} : vector<8x192xf32> to vector<8x96xf32>
    %73 = vector.extract_strided_slice %71 {offsets = [0, 0], sizes = [8, 64], strides = [1, 1]} : vector<8x96xf32> to vector<8x64xf32>
    %74 = vector.extract_strided_slice %72 {offsets = [0, 0], sizes = [8, 64], strides = [1, 1]} : vector<8x96xf32> to vector<8x64xf32>
    %75 = arith.addf %73, %74 : vector<8x64xf32>
    %76 = arith.negf %75 : vector<8x64xf32>
    %77 = math.exp %76 : vector<8x64xf32>
    %cst_19 = arith.constant 1.000000e+00 : f32
    %78 = vector.broadcast %cst_19 : f32 to vector<8x64xf32>
    %79 = arith.addf %78, %77 : vector<8x64xf32>
    %80 = arith.divf %78, %79 : vector<8x64xf32>
    %81 = vector.extract_strided_slice %80 {offsets = [0, 0], sizes = [8, 32], strides = [1, 1]} : vector<8x64xf32> to vector<8x32xf32>
    %82 = vector.extract_strided_slice %80 {offsets = [0, 32], sizes = [8, 32], strides = [1, 1]} : vector<8x64xf32> to vector<8x32xf32>
    %83 = vector.extract_strided_slice %71 {offsets = [0, 64], sizes = [8, 32], strides = [1, 1]} : vector<8x96xf32> to vector<8x32xf32>
    %84 = vector.extract_strided_slice %72 {offsets = [0, 64], sizes = [8, 32], strides = [1, 1]} : vector<8x96xf32> to vector<8x32xf32>
    %85 = vector.broadcast %7 : vector<1x32xf32> to vector<8x32xf32>
    %86 = arith.addf %84, %85 : vector<8x32xf32>
    %87 = arith.mulf %81, %86 : vector<8x32xf32>
    %88 = arith.addf %83, %87 : vector<8x32xf32>
    %89 = math.tanh %88 : vector<8x32xf32>
    %cst_20 = arith.constant 1.000000e+00 : f32
    %90 = vector.broadcast %cst_20 : f32 to vector<8x32xf32>
    %91 = arith.subf %90, %82 : vector<8x32xf32>
    %92 = arith.mulf %91, %89 : vector<8x32xf32>
    %93 = arith.mulf %82, %42 : vector<8x32xf32>
    %94 = arith.addf %92, %93 : vector<8x32xf32>
    %cst_21 = arith.constant dense<0.000000e+00> : vector<8x96xf32>
    %95 = tpu.matmul %94, %5, %cst_21 {dimension_numbers = #tpu.dot_dimension_numbers<[1], [0], [0], [1], [0, 0, 1, 1], [], []>} : vector<8x32xf32>, vector<32x96xf32>, vector<8x96xf32> -> vector<8x96xf32>
    %96 = vector.broadcast %6 : vector<1x96xf32> to vector<8x96xf32>
    %97 = arith.addf %95, %96 : vector<8x96xf32>
    %98 = vector.extract_strided_slice %70 {offsets = [0, 96], sizes = [8, 96], strides = [1, 1]} : vector<8x192xf32> to vector<8x96xf32>
    %99 = vector.extract_strided_slice %97 {offsets = [0, 0], sizes = [8, 64], strides = [1, 1]} : vector<8x96xf32> to vector<8x64xf32>
    %100 = vector.extract_strided_slice %98 {offsets = [0, 0], sizes = [8, 64], strides = [1, 1]} : vector<8x96xf32> to vector<8x64xf32>
    %101 = arith.addf %99, %100 : vector<8x64xf32>
    %102 = arith.negf %101 : vector<8x64xf32>
    %103 = math.exp %102 : vector<8x64xf32>
    %cst_22 = arith.constant 1.000000e+00 : f32
    %104 = vector.broadcast %cst_22 : f32 to vector<8x64xf32>
    %105 = arith.addf %104, %103 : vector<8x64xf32>
    %106 = arith.divf %104, %105 : vector<8x64xf32>
    %107 = vector.extract_strided_slice %106 {offsets = [0, 0], sizes = [8, 32], strides = [1, 1]} : vector<8x64xf32> to vector<8x32xf32>
    %108 = vector.extract_strided_slice %106 {offsets = [0, 32], sizes = [8, 32], strides = [1, 1]} : vector<8x64xf32> to vector<8x32xf32>
    %109 = vector.extract_strided_slice %97 {offsets = [0, 64], sizes = [8, 32], strides = [1, 1]} : vector<8x96xf32> to vector<8x32xf32>
    %110 = vector.extract_strided_slice %98 {offsets = [0, 64], sizes = [8, 32], strides = [1, 1]} : vector<8x96xf32> to vector<8x32xf32>
    %111 = vector.broadcast %8 : vector<1x32xf32> to vector<8x32xf32>
    %112 = arith.addf %110, %111 : vector<8x32xf32>
    %113 = arith.mulf %107, %112 : vector<8x32xf32>
    %114 = arith.addf %109, %113 : vector<8x32xf32>
    %115 = math.tanh %114 : vector<8x32xf32>
    %cst_23 = arith.constant 1.000000e+00 : f32
    %116 = vector.broadcast %cst_23 : f32 to vector<8x32xf32>
    %117 = arith.subf %116, %108 : vector<8x32xf32>
    %118 = arith.mulf %117, %115 : vector<8x32xf32>
    %119 = arith.mulf %108, %68 : vector<8x32xf32>
    %120 = arith.addf %118, %119 : vector<8x32xf32>
    %121 = tpu.concatenate %94, %120 in 1 : vector<8x32xf32>, vector<8x32xf32> -> vector<8x64xf32>
    %cst_24 = arith.constant dense<0.000000e+00> : vector<8x192xf32>
    %122 = tpu.matmul %121, %4, %cst_24 {dimension_numbers = #tpu.dot_dimension_numbers<[1], [0], [0], [1], [0, 0, 1, 1], [], []>} : vector<8x64xf32>, vector<64x192xf32>, vector<8x192xf32> -> vector<8x192xf32>
    %123 = vector.extract_strided_slice %14 {offsets = [16, 0], sizes = [8, 96], strides = [1, 1]} : vector<64x96xf32> to vector<8x96xf32>
    %124 = vector.extract_strided_slice %122 {offsets = [0, 0], sizes = [8, 96], strides = [1, 1]} : vector<8x192xf32> to vector<8x96xf32>
    %125 = vector.extract_strided_slice %123 {offsets = [0, 0], sizes = [8, 64], strides = [1, 1]} : vector<8x96xf32> to vector<8x64xf32>
    %126 = vector.extract_strided_slice %124 {offsets = [0, 0], sizes = [8, 64], strides = [1, 1]} : vector<8x96xf32> to vector<8x64xf32>
    %127 = arith.addf %125, %126 : vector<8x64xf32>
    %128 = arith.negf %127 : vector<8x64xf32>
    %129 = math.exp %128 : vector<8x64xf32>
    %cst_25 = arith.constant 1.000000e+00 : f32
    %130 = vector.broadcast %cst_25 : f32 to vector<8x64xf32>
    %131 = arith.addf %130, %129 : vector<8x64xf32>
    %132 = arith.divf %130, %131 : vector<8x64xf32>
    %133 = vector.extract_strided_slice %132 {offsets = [0, 0], sizes = [8, 32], strides = [1, 1]} : vector<8x64xf32> to vector<8x32xf32>
    %134 = vector.extract_strided_slice %132 {offsets = [0, 32], sizes = [8, 32], strides = [1, 1]} : vector<8x64xf32> to vector<8x32xf32>
    %135 = vector.extract_strided_slice %123 {offsets = [0, 64], sizes = [8, 32], strides = [1, 1]} : vector<8x96xf32> to vector<8x32xf32>
    %136 = vector.extract_strided_slice %124 {offsets = [0, 64], sizes = [8, 32], strides = [1, 1]} : vector<8x96xf32> to vector<8x32xf32>
    %137 = vector.broadcast %7 : vector<1x32xf32> to vector<8x32xf32>
    %138 = arith.addf %136, %137 : vector<8x32xf32>
    %139 = arith.mulf %133, %138 : vector<8x32xf32>
    %140 = arith.addf %135, %139 : vector<8x32xf32>
    %141 = math.tanh %140 : vector<8x32xf32>
    %cst_26 = arith.constant 1.000000e+00 : f32
    %142 = vector.broadcast %cst_26 : f32 to vector<8x32xf32>
    %143 = arith.subf %142, %134 : vector<8x32xf32>
    %144 = arith.mulf %143, %141 : vector<8x32xf32>
    %145 = arith.mulf %134, %94 : vector<8x32xf32>
    %146 = arith.addf %144, %145 : vector<8x32xf32>
    %cst_27 = arith.constant dense<0.000000e+00> : vector<8x96xf32>
    %147 = tpu.matmul %146, %5, %cst_27 {dimension_numbers = #tpu.dot_dimension_numbers<[1], [0], [0], [1], [0, 0, 1, 1], [], []>} : vector<8x32xf32>, vector<32x96xf32>, vector<8x96xf32> -> vector<8x96xf32>
    %148 = vector.broadcast %6 : vector<1x96xf32> to vector<8x96xf32>
    %149 = arith.addf %147, %148 : vector<8x96xf32>
    %150 = vector.extract_strided_slice %122 {offsets = [0, 96], sizes = [8, 96], strides = [1, 1]} : vector<8x192xf32> to vector<8x96xf32>
    %151 = vector.extract_strided_slice %149 {offsets = [0, 0], sizes = [8, 64], strides = [1, 1]} : vector<8x96xf32> to vector<8x64xf32>
    %152 = vector.extract_strided_slice %150 {offsets = [0, 0], sizes = [8, 64], strides = [1, 1]} : vector<8x96xf32> to vector<8x64xf32>
    %153 = arith.addf %151, %152 : vector<8x64xf32>
    %154 = arith.negf %153 : vector<8x64xf32>
    %155 = math.exp %154 : vector<8x64xf32>
    %cst_28 = arith.constant 1.000000e+00 : f32
    %156 = vector.broadcast %cst_28 : f32 to vector<8x64xf32>
    %157 = arith.addf %156, %155 : vector<8x64xf32>
    %158 = arith.divf %156, %157 : vector<8x64xf32>
    %159 = vector.extract_strided_slice %158 {offsets = [0, 0], sizes = [8, 32], strides = [1, 1]} : vector<8x64xf32> to vector<8x32xf32>
    %160 = vector.extract_strided_slice %158 {offsets = [0, 32], sizes = [8, 32], strides = [1, 1]} : vector<8x64xf32> to vector<8x32xf32>
    %161 = vector.extract_strided_slice %149 {offsets = [0, 64], sizes = [8, 32], strides = [1, 1]} : vector<8x96xf32> to vector<8x32xf32>
    %162 = vector.extract_strided_slice %150 {offsets = [0, 64], sizes = [8, 32], strides = [1, 1]} : vector<8x96xf32> to vector<8x32xf32>
    %163 = vector.broadcast %8 : vector<1x32xf32> to vector<8x32xf32>
    %164 = arith.addf %162, %163 : vector<8x32xf32>
    %165 = arith.mulf %159, %164 : vector<8x32xf32>
    %166 = arith.addf %161, %165 : vector<8x32xf32>
    %167 = math.tanh %166 : vector<8x32xf32>
    %cst_29 = arith.constant 1.000000e+00 : f32
    %168 = vector.broadcast %cst_29 : f32 to vector<8x32xf32>
    %169 = arith.subf %168, %160 : vector<8x32xf32>
    %170 = arith.mulf %169, %167 : vector<8x32xf32>
    %171 = arith.mulf %160, %120 : vector<8x32xf32>
    %172 = arith.addf %170, %171 : vector<8x32xf32>
    %173 = tpu.concatenate %146, %172 in 1 : vector<8x32xf32>, vector<8x32xf32> -> vector<8x64xf32>
    %cst_30 = arith.constant dense<0.000000e+00> : vector<8x192xf32>
    %174 = tpu.matmul %173, %4, %cst_30 {dimension_numbers = #tpu.dot_dimension_numbers<[1], [0], [0], [1], [0, 0, 1, 1], [], []>} : vector<8x64xf32>, vector<64x192xf32>, vector<8x192xf32> -> vector<8x192xf32>
    %175 = vector.extract_strided_slice %14 {offsets = [24, 0], sizes = [8, 96], strides = [1, 1]} : vector<64x96xf32> to vector<8x96xf32>
    %176 = vector.extract_strided_slice %174 {offsets = [0, 0], sizes = [8, 96], strides = [1, 1]} : vector<8x192xf32> to vector<8x96xf32>
    %177 = vector.extract_strided_slice %175 {offsets = [0, 0], sizes = [8, 64], strides = [1, 1]} : vector<8x96xf32> to vector<8x64xf32>
    %178 = vector.extract_strided_slice %176 {offsets = [0, 0], sizes = [8, 64], strides = [1, 1]} : vector<8x96xf32> to vector<8x64xf32>
    %179 = arith.addf %177, %178 : vector<8x64xf32>
    %180 = arith.negf %179 : vector<8x64xf32>
    %181 = math.exp %180 : vector<8x64xf32>
    %cst_31 = arith.constant 1.000000e+00 : f32
    %182 = vector.broadcast %cst_31 : f32 to vector<8x64xf32>
    %183 = arith.addf %182, %181 : vector<8x64xf32>
    %184 = arith.divf %182, %183 : vector<8x64xf32>
    %185 = vector.extract_strided_slice %184 {offsets = [0, 0], sizes = [8, 32], strides = [1, 1]} : vector<8x64xf32> to vector<8x32xf32>
    %186 = vector.extract_strided_slice %184 {offsets = [0, 32], sizes = [8, 32], strides = [1, 1]} : vector<8x64xf32> to vector<8x32xf32>
    %187 = vector.extract_strided_slice %175 {offsets = [0, 64], sizes = [8, 32], strides = [1, 1]} : vector<8x96xf32> to vector<8x32xf32>
    %188 = vector.extract_strided_slice %176 {offsets = [0, 64], sizes = [8, 32], strides = [1, 1]} : vector<8x96xf32> to vector<8x32xf32>
    %189 = vector.broadcast %7 : vector<1x32xf32> to vector<8x32xf32>
    %190 = arith.addf %188, %189 : vector<8x32xf32>
    %191 = arith.mulf %185, %190 : vector<8x32xf32>
    %192 = arith.addf %187, %191 : vector<8x32xf32>
    %193 = math.tanh %192 : vector<8x32xf32>
    %cst_32 = arith.constant 1.000000e+00 : f32
    %194 = vector.broadcast %cst_32 : f32 to vector<8x32xf32>
    %195 = arith.subf %194, %186 : vector<8x32xf32>
    %196 = arith.mulf %195, %193 : vector<8x32xf32>
    %197 = arith.mulf %186, %146 : vector<8x32xf32>
    %198 = arith.addf %196, %197 : vector<8x32xf32>
    %cst_33 = arith.constant dense<0.000000e+00> : vector<8x96xf32>
    %199 = tpu.matmul %198, %5, %cst_33 {dimension_numbers = #tpu.dot_dimension_numbers<[1], [0], [0], [1], [0, 0, 1, 1], [], []>} : vector<8x32xf32>, vector<32x96xf32>, vector<8x96xf32> -> vector<8x96xf32>
    %200 = vector.broadcast %6 : vector<1x96xf32> to vector<8x96xf32>
    %201 = arith.addf %199, %200 : vector<8x96xf32>
    %202 = vector.extract_strided_slice %174 {offsets = [0, 96], sizes = [8, 96], strides = [1, 1]} : vector<8x192xf32> to vector<8x96xf32>
    %203 = vector.extract_strided_slice %201 {offsets = [0, 0], sizes = [8, 64], strides = [1, 1]} : vector<8x96xf32> to vector<8x64xf32>
    %204 = vector.extract_strided_slice %202 {offsets = [0, 0], sizes = [8, 64], strides = [1, 1]} : vector<8x96xf32> to vector<8x64xf32>
    %205 = arith.addf %203, %204 : vector<8x64xf32>
    %206 = arith.negf %205 : vector<8x64xf32>
    %207 = math.exp %206 : vector<8x64xf32>
    %cst_34 = arith.constant 1.000000e+00 : f32
    %208 = vector.broadcast %cst_34 : f32 to vector<8x64xf32>
    %209 = arith.addf %208, %207 : vector<8x64xf32>
    %210 = arith.divf %208, %209 : vector<8x64xf32>
    %211 = vector.extract_strided_slice %210 {offsets = [0, 0], sizes = [8, 32], strides = [1, 1]} : vector<8x64xf32> to vector<8x32xf32>
    %212 = vector.extract_strided_slice %210 {offsets = [0, 32], sizes = [8, 32], strides = [1, 1]} : vector<8x64xf32> to vector<8x32xf32>
    %213 = vector.extract_strided_slice %201 {offsets = [0, 64], sizes = [8, 32], strides = [1, 1]} : vector<8x96xf32> to vector<8x32xf32>
    %214 = vector.extract_strided_slice %202 {offsets = [0, 64], sizes = [8, 32], strides = [1, 1]} : vector<8x96xf32> to vector<8x32xf32>
    %215 = vector.broadcast %8 : vector<1x32xf32> to vector<8x32xf32>
    %216 = arith.addf %214, %215 : vector<8x32xf32>
    %217 = arith.mulf %211, %216 : vector<8x32xf32>
    %218 = arith.addf %213, %217 : vector<8x32xf32>
    %219 = math.tanh %218 : vector<8x32xf32>
    %cst_35 = arith.constant 1.000000e+00 : f32
    %220 = vector.broadcast %cst_35 : f32 to vector<8x32xf32>
    %221 = arith.subf %220, %212 : vector<8x32xf32>
    %222 = arith.mulf %221, %219 : vector<8x32xf32>
    %223 = arith.mulf %212, %172 : vector<8x32xf32>
    %224 = arith.addf %222, %223 : vector<8x32xf32>
    %225 = tpu.concatenate %198, %224 in 1 : vector<8x32xf32>, vector<8x32xf32> -> vector<8x64xf32>
    %cst_36 = arith.constant dense<0.000000e+00> : vector<8x192xf32>
    %226 = tpu.matmul %225, %4, %cst_36 {dimension_numbers = #tpu.dot_dimension_numbers<[1], [0], [0], [1], [0, 0, 1, 1], [], []>} : vector<8x64xf32>, vector<64x192xf32>, vector<8x192xf32> -> vector<8x192xf32>
    %227 = vector.extract_strided_slice %14 {offsets = [32, 0], sizes = [8, 96], strides = [1, 1]} : vector<64x96xf32> to vector<8x96xf32>
    %228 = vector.extract_strided_slice %226 {offsets = [0, 0], sizes = [8, 96], strides = [1, 1]} : vector<8x192xf32> to vector<8x96xf32>
    %229 = vector.extract_strided_slice %227 {offsets = [0, 0], sizes = [8, 64], strides = [1, 1]} : vector<8x96xf32> to vector<8x64xf32>
    %230 = vector.extract_strided_slice %228 {offsets = [0, 0], sizes = [8, 64], strides = [1, 1]} : vector<8x96xf32> to vector<8x64xf32>
    %231 = arith.addf %229, %230 : vector<8x64xf32>
    %232 = arith.negf %231 : vector<8x64xf32>
    %233 = math.exp %232 : vector<8x64xf32>
    %cst_37 = arith.constant 1.000000e+00 : f32
    %234 = vector.broadcast %cst_37 : f32 to vector<8x64xf32>
    %235 = arith.addf %234, %233 : vector<8x64xf32>
    %236 = arith.divf %234, %235 : vector<8x64xf32>
    %237 = vector.extract_strided_slice %236 {offsets = [0, 0], sizes = [8, 32], strides = [1, 1]} : vector<8x64xf32> to vector<8x32xf32>
    %238 = vector.extract_strided_slice %236 {offsets = [0, 32], sizes = [8, 32], strides = [1, 1]} : vector<8x64xf32> to vector<8x32xf32>
    %239 = vector.extract_strided_slice %227 {offsets = [0, 64], sizes = [8, 32], strides = [1, 1]} : vector<8x96xf32> to vector<8x32xf32>
    %240 = vector.extract_strided_slice %228 {offsets = [0, 64], sizes = [8, 32], strides = [1, 1]} : vector<8x96xf32> to vector<8x32xf32>
    %241 = vector.broadcast %7 : vector<1x32xf32> to vector<8x32xf32>
    %242 = arith.addf %240, %241 : vector<8x32xf32>
    %243 = arith.mulf %237, %242 : vector<8x32xf32>
    %244 = arith.addf %239, %243 : vector<8x32xf32>
    %245 = math.tanh %244 : vector<8x32xf32>
    %cst_38 = arith.constant 1.000000e+00 : f32
    %246 = vector.broadcast %cst_38 : f32 to vector<8x32xf32>
    %247 = arith.subf %246, %238 : vector<8x32xf32>
    %248 = arith.mulf %247, %245 : vector<8x32xf32>
    %249 = arith.mulf %238, %198 : vector<8x32xf32>
    %250 = arith.addf %248, %249 : vector<8x32xf32>
    %cst_39 = arith.constant dense<0.000000e+00> : vector<8x96xf32>
    %251 = tpu.matmul %250, %5, %cst_39 {dimension_numbers = #tpu.dot_dimension_numbers<[1], [0], [0], [1], [0, 0, 1, 1], [], []>} : vector<8x32xf32>, vector<32x96xf32>, vector<8x96xf32> -> vector<8x96xf32>
    %252 = vector.broadcast %6 : vector<1x96xf32> to vector<8x96xf32>
    %253 = arith.addf %251, %252 : vector<8x96xf32>
    %254 = vector.extract_strided_slice %226 {offsets = [0, 96], sizes = [8, 96], strides = [1, 1]} : vector<8x192xf32> to vector<8x96xf32>
    %255 = vector.extract_strided_slice %253 {offsets = [0, 0], sizes = [8, 64], strides = [1, 1]} : vector<8x96xf32> to vector<8x64xf32>
    %256 = vector.extract_strided_slice %254 {offsets = [0, 0], sizes = [8, 64], strides = [1, 1]} : vector<8x96xf32> to vector<8x64xf32>
    %257 = arith.addf %255, %256 : vector<8x64xf32>
    %258 = arith.negf %257 : vector<8x64xf32>
    %259 = math.exp %258 : vector<8x64xf32>
    %cst_40 = arith.constant 1.000000e+00 : f32
    %260 = vector.broadcast %cst_40 : f32 to vector<8x64xf32>
    %261 = arith.addf %260, %259 : vector<8x64xf32>
    %262 = arith.divf %260, %261 : vector<8x64xf32>
    %263 = vector.extract_strided_slice %262 {offsets = [0, 0], sizes = [8, 32], strides = [1, 1]} : vector<8x64xf32> to vector<8x32xf32>
    %264 = vector.extract_strided_slice %262 {offsets = [0, 32], sizes = [8, 32], strides = [1, 1]} : vector<8x64xf32> to vector<8x32xf32>
    %265 = vector.extract_strided_slice %253 {offsets = [0, 64], sizes = [8, 32], strides = [1, 1]} : vector<8x96xf32> to vector<8x32xf32>
    %266 = vector.extract_strided_slice %254 {offsets = [0, 64], sizes = [8, 32], strides = [1, 1]} : vector<8x96xf32> to vector<8x32xf32>
    %267 = vector.broadcast %8 : vector<1x32xf32> to vector<8x32xf32>
    %268 = arith.addf %266, %267 : vector<8x32xf32>
    %269 = arith.mulf %263, %268 : vector<8x32xf32>
    %270 = arith.addf %265, %269 : vector<8x32xf32>
    %271 = math.tanh %270 : vector<8x32xf32>
    %cst_41 = arith.constant 1.000000e+00 : f32
    %272 = vector.broadcast %cst_41 : f32 to vector<8x32xf32>
    %273 = arith.subf %272, %264 : vector<8x32xf32>
    %274 = arith.mulf %273, %271 : vector<8x32xf32>
    %275 = arith.mulf %264, %224 : vector<8x32xf32>
    %276 = arith.addf %274, %275 : vector<8x32xf32>
    %277 = tpu.concatenate %250, %276 in 1 : vector<8x32xf32>, vector<8x32xf32> -> vector<8x64xf32>
    %cst_42 = arith.constant dense<0.000000e+00> : vector<8x192xf32>
    %278 = tpu.matmul %277, %4, %cst_42 {dimension_numbers = #tpu.dot_dimension_numbers<[1], [0], [0], [1], [0, 0, 1, 1], [], []>} : vector<8x64xf32>, vector<64x192xf32>, vector<8x192xf32> -> vector<8x192xf32>
    %279 = vector.extract_strided_slice %14 {offsets = [40, 0], sizes = [8, 96], strides = [1, 1]} : vector<64x96xf32> to vector<8x96xf32>
    %280 = vector.extract_strided_slice %278 {offsets = [0, 0], sizes = [8, 96], strides = [1, 1]} : vector<8x192xf32> to vector<8x96xf32>
    %281 = vector.extract_strided_slice %279 {offsets = [0, 0], sizes = [8, 64], strides = [1, 1]} : vector<8x96xf32> to vector<8x64xf32>
    %282 = vector.extract_strided_slice %280 {offsets = [0, 0], sizes = [8, 64], strides = [1, 1]} : vector<8x96xf32> to vector<8x64xf32>
    %283 = arith.addf %281, %282 : vector<8x64xf32>
    %284 = arith.negf %283 : vector<8x64xf32>
    %285 = math.exp %284 : vector<8x64xf32>
    %cst_43 = arith.constant 1.000000e+00 : f32
    %286 = vector.broadcast %cst_43 : f32 to vector<8x64xf32>
    %287 = arith.addf %286, %285 : vector<8x64xf32>
    %288 = arith.divf %286, %287 : vector<8x64xf32>
    %289 = vector.extract_strided_slice %288 {offsets = [0, 0], sizes = [8, 32], strides = [1, 1]} : vector<8x64xf32> to vector<8x32xf32>
    %290 = vector.extract_strided_slice %288 {offsets = [0, 32], sizes = [8, 32], strides = [1, 1]} : vector<8x64xf32> to vector<8x32xf32>
    %291 = vector.extract_strided_slice %279 {offsets = [0, 64], sizes = [8, 32], strides = [1, 1]} : vector<8x96xf32> to vector<8x32xf32>
    %292 = vector.extract_strided_slice %280 {offsets = [0, 64], sizes = [8, 32], strides = [1, 1]} : vector<8x96xf32> to vector<8x32xf32>
    %293 = vector.broadcast %7 : vector<1x32xf32> to vector<8x32xf32>
    %294 = arith.addf %292, %293 : vector<8x32xf32>
    %295 = arith.mulf %289, %294 : vector<8x32xf32>
    %296 = arith.addf %291, %295 : vector<8x32xf32>
    %297 = math.tanh %296 : vector<8x32xf32>
    %cst_44 = arith.constant 1.000000e+00 : f32
    %298 = vector.broadcast %cst_44 : f32 to vector<8x32xf32>
    %299 = arith.subf %298, %290 : vector<8x32xf32>
    %300 = arith.mulf %299, %297 : vector<8x32xf32>
    %301 = arith.mulf %290, %250 : vector<8x32xf32>
    %302 = arith.addf %300, %301 : vector<8x32xf32>
    %cst_45 = arith.constant dense<0.000000e+00> : vector<8x96xf32>
    %303 = tpu.matmul %302, %5, %cst_45 {dimension_numbers = #tpu.dot_dimension_numbers<[1], [0], [0], [1], [0, 0, 1, 1], [], []>} : vector<8x32xf32>, vector<32x96xf32>, vector<8x96xf32> -> vector<8x96xf32>
    %304 = vector.broadcast %6 : vector<1x96xf32> to vector<8x96xf32>
    %305 = arith.addf %303, %304 : vector<8x96xf32>
    %306 = vector.extract_strided_slice %278 {offsets = [0, 96], sizes = [8, 96], strides = [1, 1]} : vector<8x192xf32> to vector<8x96xf32>
    %307 = vector.extract_strided_slice %305 {offsets = [0, 0], sizes = [8, 64], strides = [1, 1]} : vector<8x96xf32> to vector<8x64xf32>
    %308 = vector.extract_strided_slice %306 {offsets = [0, 0], sizes = [8, 64], strides = [1, 1]} : vector<8x96xf32> to vector<8x64xf32>
    %309 = arith.addf %307, %308 : vector<8x64xf32>
    %310 = arith.negf %309 : vector<8x64xf32>
    %311 = math.exp %310 : vector<8x64xf32>
    %cst_46 = arith.constant 1.000000e+00 : f32
    %312 = vector.broadcast %cst_46 : f32 to vector<8x64xf32>
    %313 = arith.addf %312, %311 : vector<8x64xf32>
    %314 = arith.divf %312, %313 : vector<8x64xf32>
    %315 = vector.extract_strided_slice %314 {offsets = [0, 0], sizes = [8, 32], strides = [1, 1]} : vector<8x64xf32> to vector<8x32xf32>
    %316 = vector.extract_strided_slice %314 {offsets = [0, 32], sizes = [8, 32], strides = [1, 1]} : vector<8x64xf32> to vector<8x32xf32>
    %317 = vector.extract_strided_slice %305 {offsets = [0, 64], sizes = [8, 32], strides = [1, 1]} : vector<8x96xf32> to vector<8x32xf32>
    %318 = vector.extract_strided_slice %306 {offsets = [0, 64], sizes = [8, 32], strides = [1, 1]} : vector<8x96xf32> to vector<8x32xf32>
    %319 = vector.broadcast %8 : vector<1x32xf32> to vector<8x32xf32>
    %320 = arith.addf %318, %319 : vector<8x32xf32>
    %321 = arith.mulf %315, %320 : vector<8x32xf32>
    %322 = arith.addf %317, %321 : vector<8x32xf32>
    %323 = math.tanh %322 : vector<8x32xf32>
    %cst_47 = arith.constant 1.000000e+00 : f32
    %324 = vector.broadcast %cst_47 : f32 to vector<8x32xf32>
    %325 = arith.subf %324, %316 : vector<8x32xf32>
    %326 = arith.mulf %325, %323 : vector<8x32xf32>
    %327 = arith.mulf %316, %276 : vector<8x32xf32>
    %328 = arith.addf %326, %327 : vector<8x32xf32>
    %329 = tpu.concatenate %302, %328 in 1 : vector<8x32xf32>, vector<8x32xf32> -> vector<8x64xf32>
    %cst_48 = arith.constant dense<0.000000e+00> : vector<8x192xf32>
    %330 = tpu.matmul %329, %4, %cst_48 {dimension_numbers = #tpu.dot_dimension_numbers<[1], [0], [0], [1], [0, 0, 1, 1], [], []>} : vector<8x64xf32>, vector<64x192xf32>, vector<8x192xf32> -> vector<8x192xf32>
    %331 = vector.extract_strided_slice %14 {offsets = [48, 0], sizes = [8, 96], strides = [1, 1]} : vector<64x96xf32> to vector<8x96xf32>
    %332 = vector.extract_strided_slice %330 {offsets = [0, 0], sizes = [8, 96], strides = [1, 1]} : vector<8x192xf32> to vector<8x96xf32>
    %333 = vector.extract_strided_slice %331 {offsets = [0, 0], sizes = [8, 64], strides = [1, 1]} : vector<8x96xf32> to vector<8x64xf32>
    %334 = vector.extract_strided_slice %332 {offsets = [0, 0], sizes = [8, 64], strides = [1, 1]} : vector<8x96xf32> to vector<8x64xf32>
    %335 = arith.addf %333, %334 : vector<8x64xf32>
    %336 = arith.negf %335 : vector<8x64xf32>
    %337 = math.exp %336 : vector<8x64xf32>
    %cst_49 = arith.constant 1.000000e+00 : f32
    %338 = vector.broadcast %cst_49 : f32 to vector<8x64xf32>
    %339 = arith.addf %338, %337 : vector<8x64xf32>
    %340 = arith.divf %338, %339 : vector<8x64xf32>
    %341 = vector.extract_strided_slice %340 {offsets = [0, 0], sizes = [8, 32], strides = [1, 1]} : vector<8x64xf32> to vector<8x32xf32>
    %342 = vector.extract_strided_slice %340 {offsets = [0, 32], sizes = [8, 32], strides = [1, 1]} : vector<8x64xf32> to vector<8x32xf32>
    %343 = vector.extract_strided_slice %331 {offsets = [0, 64], sizes = [8, 32], strides = [1, 1]} : vector<8x96xf32> to vector<8x32xf32>
    %344 = vector.extract_strided_slice %332 {offsets = [0, 64], sizes = [8, 32], strides = [1, 1]} : vector<8x96xf32> to vector<8x32xf32>
    %345 = vector.broadcast %7 : vector<1x32xf32> to vector<8x32xf32>
    %346 = arith.addf %344, %345 : vector<8x32xf32>
    %347 = arith.mulf %341, %346 : vector<8x32xf32>
    %348 = arith.addf %343, %347 : vector<8x32xf32>
    %349 = math.tanh %348 : vector<8x32xf32>
    %cst_50 = arith.constant 1.000000e+00 : f32
    %350 = vector.broadcast %cst_50 : f32 to vector<8x32xf32>
    %351 = arith.subf %350, %342 : vector<8x32xf32>
    %352 = arith.mulf %351, %349 : vector<8x32xf32>
    %353 = arith.mulf %342, %302 : vector<8x32xf32>
    %354 = arith.addf %352, %353 : vector<8x32xf32>
    %cst_51 = arith.constant dense<0.000000e+00> : vector<8x96xf32>
    %355 = tpu.matmul %354, %5, %cst_51 {dimension_numbers = #tpu.dot_dimension_numbers<[1], [0], [0], [1], [0, 0, 1, 1], [], []>} : vector<8x32xf32>, vector<32x96xf32>, vector<8x96xf32> -> vector<8x96xf32>
    %356 = vector.broadcast %6 : vector<1x96xf32> to vector<8x96xf32>
    %357 = arith.addf %355, %356 : vector<8x96xf32>
    %358 = vector.extract_strided_slice %330 {offsets = [0, 96], sizes = [8, 96], strides = [1, 1]} : vector<8x192xf32> to vector<8x96xf32>
    %359 = vector.extract_strided_slice %357 {offsets = [0, 0], sizes = [8, 64], strides = [1, 1]} : vector<8x96xf32> to vector<8x64xf32>
    %360 = vector.extract_strided_slice %358 {offsets = [0, 0], sizes = [8, 64], strides = [1, 1]} : vector<8x96xf32> to vector<8x64xf32>
    %361 = arith.addf %359, %360 : vector<8x64xf32>
    %362 = arith.negf %361 : vector<8x64xf32>
    %363 = math.exp %362 : vector<8x64xf32>
    %cst_52 = arith.constant 1.000000e+00 : f32
    %364 = vector.broadcast %cst_52 : f32 to vector<8x64xf32>
    %365 = arith.addf %364, %363 : vector<8x64xf32>
    %366 = arith.divf %364, %365 : vector<8x64xf32>
    %367 = vector.extract_strided_slice %366 {offsets = [0, 0], sizes = [8, 32], strides = [1, 1]} : vector<8x64xf32> to vector<8x32xf32>
    %368 = vector.extract_strided_slice %366 {offsets = [0, 32], sizes = [8, 32], strides = [1, 1]} : vector<8x64xf32> to vector<8x32xf32>
    %369 = vector.extract_strided_slice %357 {offsets = [0, 64], sizes = [8, 32], strides = [1, 1]} : vector<8x96xf32> to vector<8x32xf32>
    %370 = vector.extract_strided_slice %358 {offsets = [0, 64], sizes = [8, 32], strides = [1, 1]} : vector<8x96xf32> to vector<8x32xf32>
    %371 = vector.broadcast %8 : vector<1x32xf32> to vector<8x32xf32>
    %372 = arith.addf %370, %371 : vector<8x32xf32>
    %373 = arith.mulf %367, %372 : vector<8x32xf32>
    %374 = arith.addf %369, %373 : vector<8x32xf32>
    %375 = math.tanh %374 : vector<8x32xf32>
    %cst_53 = arith.constant 1.000000e+00 : f32
    %376 = vector.broadcast %cst_53 : f32 to vector<8x32xf32>
    %377 = arith.subf %376, %368 : vector<8x32xf32>
    %378 = arith.mulf %377, %375 : vector<8x32xf32>
    %379 = arith.mulf %368, %328 : vector<8x32xf32>
    %380 = arith.addf %378, %379 : vector<8x32xf32>
    %381 = tpu.concatenate %354, %380 in 1 : vector<8x32xf32>, vector<8x32xf32> -> vector<8x64xf32>
    %cst_54 = arith.constant dense<0.000000e+00> : vector<8x192xf32>
    %382 = tpu.matmul %381, %4, %cst_54 {dimension_numbers = #tpu.dot_dimension_numbers<[1], [0], [0], [1], [0, 0, 1, 1], [], []>} : vector<8x64xf32>, vector<64x192xf32>, vector<8x192xf32> -> vector<8x192xf32>
    %383 = vector.extract_strided_slice %14 {offsets = [56, 0], sizes = [8, 96], strides = [1, 1]} : vector<64x96xf32> to vector<8x96xf32>
    %384 = vector.extract_strided_slice %382 {offsets = [0, 0], sizes = [8, 96], strides = [1, 1]} : vector<8x192xf32> to vector<8x96xf32>
    %385 = vector.extract_strided_slice %383 {offsets = [0, 0], sizes = [8, 64], strides = [1, 1]} : vector<8x96xf32> to vector<8x64xf32>
    %386 = vector.extract_strided_slice %384 {offsets = [0, 0], sizes = [8, 64], strides = [1, 1]} : vector<8x96xf32> to vector<8x64xf32>
    %387 = arith.addf %385, %386 : vector<8x64xf32>
    %388 = arith.negf %387 : vector<8x64xf32>
    %389 = math.exp %388 : vector<8x64xf32>
    %cst_55 = arith.constant 1.000000e+00 : f32
    %390 = vector.broadcast %cst_55 : f32 to vector<8x64xf32>
    %391 = arith.addf %390, %389 : vector<8x64xf32>
    %392 = arith.divf %390, %391 : vector<8x64xf32>
    %393 = vector.extract_strided_slice %392 {offsets = [0, 0], sizes = [8, 32], strides = [1, 1]} : vector<8x64xf32> to vector<8x32xf32>
    %394 = vector.extract_strided_slice %392 {offsets = [0, 32], sizes = [8, 32], strides = [1, 1]} : vector<8x64xf32> to vector<8x32xf32>
    %395 = vector.extract_strided_slice %383 {offsets = [0, 64], sizes = [8, 32], strides = [1, 1]} : vector<8x96xf32> to vector<8x32xf32>
    %396 = vector.extract_strided_slice %384 {offsets = [0, 64], sizes = [8, 32], strides = [1, 1]} : vector<8x96xf32> to vector<8x32xf32>
    %397 = vector.broadcast %7 : vector<1x32xf32> to vector<8x32xf32>
    %398 = arith.addf %396, %397 : vector<8x32xf32>
    %399 = arith.mulf %393, %398 : vector<8x32xf32>
    %400 = arith.addf %395, %399 : vector<8x32xf32>
    %401 = math.tanh %400 : vector<8x32xf32>
    %cst_56 = arith.constant 1.000000e+00 : f32
    %402 = vector.broadcast %cst_56 : f32 to vector<8x32xf32>
    %403 = arith.subf %402, %394 : vector<8x32xf32>
    %404 = arith.mulf %403, %401 : vector<8x32xf32>
    %405 = arith.mulf %394, %354 : vector<8x32xf32>
    %406 = arith.addf %404, %405 : vector<8x32xf32>
    %cst_57 = arith.constant dense<0.000000e+00> : vector<8x96xf32>
    %407 = tpu.matmul %406, %5, %cst_57 {dimension_numbers = #tpu.dot_dimension_numbers<[1], [0], [0], [1], [0, 0, 1, 1], [], []>} : vector<8x32xf32>, vector<32x96xf32>, vector<8x96xf32> -> vector<8x96xf32>
    %408 = vector.broadcast %6 : vector<1x96xf32> to vector<8x96xf32>
    %409 = arith.addf %407, %408 : vector<8x96xf32>
    %410 = vector.extract_strided_slice %382 {offsets = [0, 96], sizes = [8, 96], strides = [1, 1]} : vector<8x192xf32> to vector<8x96xf32>
    %411 = vector.extract_strided_slice %409 {offsets = [0, 0], sizes = [8, 64], strides = [1, 1]} : vector<8x96xf32> to vector<8x64xf32>
    %412 = vector.extract_strided_slice %410 {offsets = [0, 0], sizes = [8, 64], strides = [1, 1]} : vector<8x96xf32> to vector<8x64xf32>
    %413 = arith.addf %411, %412 : vector<8x64xf32>
    %414 = arith.negf %413 : vector<8x64xf32>
    %415 = math.exp %414 : vector<8x64xf32>
    %cst_58 = arith.constant 1.000000e+00 : f32
    %416 = vector.broadcast %cst_58 : f32 to vector<8x64xf32>
    %417 = arith.addf %416, %415 : vector<8x64xf32>
    %418 = arith.divf %416, %417 : vector<8x64xf32>
    %419 = vector.extract_strided_slice %418 {offsets = [0, 0], sizes = [8, 32], strides = [1, 1]} : vector<8x64xf32> to vector<8x32xf32>
    %420 = vector.extract_strided_slice %418 {offsets = [0, 32], sizes = [8, 32], strides = [1, 1]} : vector<8x64xf32> to vector<8x32xf32>
    %421 = vector.extract_strided_slice %409 {offsets = [0, 64], sizes = [8, 32], strides = [1, 1]} : vector<8x96xf32> to vector<8x32xf32>
    %422 = vector.extract_strided_slice %410 {offsets = [0, 64], sizes = [8, 32], strides = [1, 1]} : vector<8x96xf32> to vector<8x32xf32>
    %423 = vector.broadcast %8 : vector<1x32xf32> to vector<8x32xf32>
    %424 = arith.addf %422, %423 : vector<8x32xf32>
    %425 = arith.mulf %419, %424 : vector<8x32xf32>
    %426 = arith.addf %421, %425 : vector<8x32xf32>
    %427 = math.tanh %426 : vector<8x32xf32>
    %cst_59 = arith.constant 1.000000e+00 : f32
    %428 = vector.broadcast %cst_59 : f32 to vector<8x32xf32>
    %429 = arith.subf %428, %420 : vector<8x32xf32>
    %430 = arith.mulf %429, %427 : vector<8x32xf32>
    %431 = arith.mulf %420, %380 : vector<8x32xf32>
    %432 = arith.addf %430, %431 : vector<8x32xf32>
    %433 = tpu.concatenate %68, %120, %172, %224, %276, %328, %380, %432 in 0 : vector<8x32xf32>, vector<8x32xf32>, vector<8x32xf32>, vector<8x32xf32>, vector<8x32xf32>, vector<8x32xf32>, vector<8x32xf32>, vector<8x32xf32> -> vector<64x32xf32>
    %c104 = arith.constant 104 : index
    %c0_60 = arith.constant 0 : index
    %434 = vector.load %arg2[%c104, %c0_60] : memref<352x192xf32, #tpu.memory_space<vmem>>, vector<32x32xf32>
    %c304 = arith.constant 304 : index
    %c0_61 = arith.constant 0 : index
    %435 = vector.load %arg2[%c304, %c0_61] : memref<352x192xf32, #tpu.memory_space<vmem>>, vector<1x32xf32>
    %cst_62 = arith.constant dense<0.000000e+00> : vector<64x32xf32>
    %436 = tpu.matmul %433, %434, %cst_62 {dimension_numbers = #tpu.dot_dimension_numbers<[1], [0], [0], [1], [0, 0, 1, 1], [], []>} : vector<64x32xf32>, vector<32x32xf32>, vector<64x32xf32> -> vector<64x32xf32>
    %437 = vector.broadcast %435 : vector<1x32xf32> to vector<64x32xf32>
    %438 = arith.addf %436, %437 : vector<64x32xf32>
    %cst_63 = arith.constant 0.000000e+00 : f32
    %439 = vector.broadcast %cst_63 : f32 to vector<64x32xf32>
    %440 = arith.cmpf oge, %438, %439 : vector<64x32xf32>
    %441 = vector.broadcast %0 : f32 to vector<64x32xf32>
    %442 = arith.mulf %441, %438 : vector<64x32xf32>
    %443 = arith.select %440, %438, %442 : vector<64x32xi1>, vector<64x32xf32>
    %c136 = arith.constant 136 : index
    %c0_64 = arith.constant 0 : index
    %444 = vector.load %arg2[%c136, %c0_64] : memref<352x192xf32, #tpu.memory_space<vmem>>, vector<32x32xf32>
    %c312 = arith.constant 312 : index
    %c0_65 = arith.constant 0 : index
    %445 = vector.load %arg2[%c312, %c0_65] : memref<352x192xf32, #tpu.memory_space<vmem>>, vector<1x32xf32>
    %cst_66 = arith.constant dense<0.000000e+00> : vector<64x32xf32>
    %446 = tpu.matmul %443, %444, %cst_66 {dimension_numbers = #tpu.dot_dimension_numbers<[1], [0], [0], [1], [0, 0, 1, 1], [], []>} : vector<64x32xf32>, vector<32x32xf32>, vector<64x32xf32> -> vector<64x32xf32>
    %447 = vector.broadcast %445 : vector<1x32xf32> to vector<64x32xf32>
    %448 = arith.addf %446, %447 : vector<64x32xf32>
    %cst_67 = arith.constant 0.000000e+00 : f32
    %449 = vector.broadcast %cst_67 : f32 to vector<64x32xf32>
    %450 = arith.cmpf oge, %448, %449 : vector<64x32xf32>
    %451 = vector.broadcast %1 : f32 to vector<64x32xf32>
    %452 = arith.mulf %451, %448 : vector<64x32xf32>
    %453 = arith.select %450, %448, %452 : vector<64x32xi1>, vector<64x32xf32>
    %c168 = arith.constant 168 : index
    %c0_68 = arith.constant 0 : index
    %454 = vector.load %arg2[%c168, %c0_68] : memref<352x192xf32, #tpu.memory_space<vmem>>, vector<32x16xf32>
    %c320 = arith.constant 320 : index
    %c0_69 = arith.constant 0 : index
    %455 = vector.load %arg2[%c320, %c0_69] : memref<352x192xf32, #tpu.memory_space<vmem>>, vector<1x16xf32>
    %cst_70 = arith.constant dense<0.000000e+00> : vector<64x16xf32>
    %456 = tpu.matmul %453, %454, %cst_70 {dimension_numbers = #tpu.dot_dimension_numbers<[1], [0], [0], [1], [0, 0, 1, 1], [], []>} : vector<64x32xf32>, vector<32x16xf32>, vector<64x16xf32> -> vector<64x16xf32>
    %457 = vector.broadcast %455 : vector<1x16xf32> to vector<64x16xf32>
    %458 = arith.addf %456, %457 : vector<64x16xf32>
    %459 = vector.extract_strided_slice %458 {offsets = [0, 0], sizes = [64, 8], strides = [1, 1]} : vector<64x16xf32> to vector<64x8xf32>
    %460 = vector.extract_strided_slice %458 {offsets = [0, 8], sizes = [64, 8], strides = [1, 1]} : vector<64x16xf32> to vector<64x8xf32>
    %c0_71 = arith.constant 0 : index
    %c0_72 = arith.constant 0 : index
    %461 = vector.load %arg1[%c0_71, %c0_72] : memref<64x8xf32, #tpu.memory_space<vmem>>, vector<64x8xf32>
    %cst_73 = arith.constant 5.000000e-01 : f32
    %462 = vector.broadcast %cst_73 : f32 to vector<64x8xf32>
    %463 = arith.mulf %462, %460 : vector<64x8xf32>
    %464 = math.exp %463 : vector<64x8xf32>
    %465 = arith.mulf %461, %464 : vector<64x8xf32>
    %466 = arith.addf %459, %465 : vector<64x8xf32>
    %c200 = arith.constant 200 : index
    %c0_74 = arith.constant 0 : index
    %467 = vector.load %arg2[%c200, %c0_74] : memref<352x192xf32, #tpu.memory_space<vmem>>, vector<8x32xf32>
    %c328 = arith.constant 328 : index
    %c0_75 = arith.constant 0 : index
    %468 = vector.load %arg2[%c328, %c0_75] : memref<352x192xf32, #tpu.memory_space<vmem>>, vector<1x32xf32>
    %cst_76 = arith.constant dense<0.000000e+00> : vector<64x32xf32>
    %469 = tpu.matmul %466, %467, %cst_76 {dimension_numbers = #tpu.dot_dimension_numbers<[1], [0], [0], [1], [0, 0, 1, 1], [], []>} : vector<64x8xf32>, vector<8x32xf32>, vector<64x32xf32> -> vector<64x32xf32>
    %470 = vector.broadcast %468 : vector<1x32xf32> to vector<64x32xf32>
    %471 = arith.addf %469, %470 : vector<64x32xf32>
    %cst_77 = arith.constant 0.000000e+00 : f32
    %472 = vector.broadcast %cst_77 : f32 to vector<64x32xf32>
    %473 = arith.cmpf oge, %471, %472 : vector<64x32xf32>
    %474 = vector.broadcast %2 : f32 to vector<64x32xf32>
    %475 = arith.mulf %474, %471 : vector<64x32xf32>
    %476 = arith.select %473, %471, %475 : vector<64x32xi1>, vector<64x32xf32>
    %c208 = arith.constant 208 : index
    %c0_78 = arith.constant 0 : index
    %477 = vector.load %arg2[%c208, %c0_78] : memref<352x192xf32, #tpu.memory_space<vmem>>, vector<32x32xf32>
    %c336 = arith.constant 336 : index
    %c0_79 = arith.constant 0 : index
    %478 = vector.load %arg2[%c336, %c0_79] : memref<352x192xf32, #tpu.memory_space<vmem>>, vector<1x32xf32>
    %cst_80 = arith.constant dense<0.000000e+00> : vector<64x32xf32>
    %479 = tpu.matmul %476, %477, %cst_80 {dimension_numbers = #tpu.dot_dimension_numbers<[1], [0], [0], [1], [0, 0, 1, 1], [], []>} : vector<64x32xf32>, vector<32x32xf32>, vector<64x32xf32> -> vector<64x32xf32>
    %480 = vector.broadcast %478 : vector<1x32xf32> to vector<64x32xf32>
    %481 = arith.addf %479, %480 : vector<64x32xf32>
    %cst_81 = arith.constant 0.000000e+00 : f32
    %482 = vector.broadcast %cst_81 : f32 to vector<64x32xf32>
    %483 = arith.cmpf oge, %481, %482 : vector<64x32xf32>
    %484 = vector.broadcast %3 : f32 to vector<64x32xf32>
    %485 = arith.mulf %484, %481 : vector<64x32xf32>
    %486 = arith.select %483, %481, %485 : vector<64x32xi1>, vector<64x32xf32>
    %c240 = arith.constant 240 : index
    %c0_82 = arith.constant 0 : index
    %487 = vector.load %arg2[%c240, %c0_82] : memref<352x192xf32, #tpu.memory_space<vmem>>, vector<32x4xf32>
    %c344 = arith.constant 344 : index
    %c0_83 = arith.constant 0 : index
    %488 = vector.load %arg2[%c344, %c0_83] : memref<352x192xf32, #tpu.memory_space<vmem>>, vector<1x4xf32>
    %cst_84 = arith.constant dense<0.000000e+00> : vector<64x4xf32>
    %489 = tpu.matmul %486, %487, %cst_84 {dimension_numbers = #tpu.dot_dimension_numbers<[1], [0], [0], [1], [0, 0, 1, 1], [], []>} : vector<64x32xf32>, vector<32x4xf32>, vector<64x4xf32> -> vector<64x4xf32>
    %490 = vector.broadcast %488 : vector<1x4xf32> to vector<64x4xf32>
    %491 = arith.addf %489, %490 : vector<64x4xf32>
    %492 = arith.negf %491 : vector<64x4xf32>
    %493 = math.exp %492 : vector<64x4xf32>
    %cst_85 = arith.constant 1.000000e+00 : f32
    %494 = vector.broadcast %cst_85 : f32 to vector<64x4xf32>
    %495 = arith.addf %494, %493 : vector<64x4xf32>
    %496 = arith.divf %494, %495 : vector<64x4xf32>
    %497 = tpu.concatenate %406, %432 in 0 : vector<8x32xf32>, vector<8x32xf32> -> vector<16x32xf32>
    %cst_86 = arith.constant 0.000000e+00 : f32
    %498 = vector.broadcast %cst_86 : f32 to vector<48x32xf32>
    %499 = tpu.concatenate %497, %498 in 0 : vector<16x32xf32>, vector<48x32xf32> -> vector<64x32xf32>
    %cst_87 = arith.constant 0.000000e+00 : f32
    %500 = vector.broadcast %cst_87 : f32 to vector<64x76xf32>
    %501 = tpu.concatenate %496, %458, %499, %500 in 1 : vector<64x4xf32>, vector<64x16xf32>, vector<64x32xf32>, vector<64x76xf32> -> vector<64x128xf32>
    %c0_88 = arith.constant 0 : index
    %c0_89 = arith.constant 0 : index
    %502 = vector.load %arg4[%c0_88, %c0_89] : memref<64x128xf32, #tpu.memory_space<vmem>>, vector<64x128xf32>
    tpu.vector_store %arg4[%c0_88, %c0_89], %501 {strides = array<i32>} : memref<64x128xf32, #tpu.memory_space<vmem>>, vector<64x128xf32>,
    return
  }
}

</mosaic_0001>

<bundles_post_ra>
// kernel: omni_anomaly_forward.1
= control target key start
LH: loop header
LB: loop body
LE: loop exit
PB: predicated region body
PF: predicated region fallthrough
CT: control target
= control target key end

     0   :  { %9 = vsyncpa [#allocation3], 0  ;;  %s4644_s0 = inlined_call_operand.vmem [shape: f32[64,4], index: 0, kind: input, shape index: {}]   ;;  %s4645_s1 = inlined_call_operand.vmem [shape: f32[64,8], index: 1, kind: input, shape index: {}]   ;;  %s4646_s2 = inlined_call_operand.vmem [shape: f32[352,192], index: 2, kind: input, shape index: {}]   ;;  %s4647_s3 = inlined_call_operand.vmem [shape: f32[4], index: 3, kind: input, shape index: {}]   ;;  %s4648_s4 = inlined_call_operand.vmem [shape: f32[64,128], index: 4, kind: output, shape index: {}]  }
   0x1   :  { %s22_s17 = sshll.u32 %s4647_s3, 4  ;;  %s23_s17 = int_to_ptr.vmem [resolvable:$true] %s22_s17 }
   0x2   :  { %s3843_s18 = scalar_lea.vmem %s23_s17, 16  ;;  %p3848_p1 = scmp.lt.s32.totalorder %s23_s17, %s23_s17 }
   0x3   :  { %p3844_p0 = scmp.ne.s32.totalorder %s23_s17, %s3843_s18  ;;  %p3849_p2 = scmp.lt.s32.totalorder %s3843_s18, %s3843_s18 }
   0x5   :  { %p3850_p3 = por %p3849_p2, %p3848_p1 }
   0x7   :  { %p3851_p4 = pnand %p3850_p3, %p3844_p0 }
   0x9   :  { %3854 = shalt.err (!%p3851_p4)
}
   0xa   :  { %s3857_s19 = smov [#allocation2]  }
   0xb   :  { %25 = dma.vmem_to_smem %s23_s17, 16, %s3857_s19, [#allocation3]  }
   0xc   :  { %3855 = dma.done.wait [#allocation3], 16  }
   0xd   :  { %3856 = vsyncadd [#allocation3], 4294967280 }
   0xe   :  { %29 = sfence }
   0xf   :  { %v35_v0 = vld [vmem:[%s4646_s2 + $0x18] sm:$0xff]  ;;  %v37_v1 = vld [vmem:[%s4646_s2 + $0x28] sm:$0xff]  ;;  %v34_v2 = vld [vmem:[%s4646_s2 + $0x10] sm:$0xff]  ;;  %v3858_v7 = vmov 0.0   ;;  %vm92_vm0 = vcmask 1043456   ;;  %vm67_vm1 = vcmask 31744  }
  0x10   :  { %v3904_v3 = vpack.c.bf16 %v37_v1, %v35_v0  ;;  %v36_v4 = vld [vmem:[%s4646_s2 + $0x20] sm:$0xff]  ;;  %v39_v5 = vld [vmem:[%s4646_s2 + $0x38] sm:$0xff]  ;;  %v41_v6 = vld [vmem:[%s4646_s2 + $0x48] sm:$0xff]  ;;  %269 = vmatprep.mubr.f32.mxu1 %v3858_v7  ;;  %s3859_s28 = smov 64   ;;  %s3860_s15 = smov 96   ;;  %v3861_v51 = vmov 0.0|0.0  }
  0x11   :  { %v3916_v8 = vpack.c.bf16 %v36_v4, %v34_v2  ;;  %v3918_v9 = vpack.c.bf16 %v41_v6, %v39_v5  ;;  %v38_v10 = vld [vmem:[%s4646_s2 + $0x30] sm:$0xff]  ;;  %v40_v11 = vld [vmem:[%s4646_s2 + $0x40] sm:$0xff]  ;;  %v43_v12 = vld [vmem:[%s4646_s2 + $0x58] sm:$0xff]  ;;  %s3862_s25 = smov 32   ;;  %vm3863_vm2 = vmmov 0   ;;  %vm310_vm3 = vcmask 261120  }
  0x12   :  { %3473 = vmatprep.subr.bf16.mxu1 %v3904_v3  ;;  %v45_v13 = vld [vmem:[%s4646_s2 + $0x68] sm:$0xff]  ;;  %v3934_v14 = vpack.c.bf16 %v40_v11, %v38_v10  ;;  %v65_v15 = vld [vmem:[%s4646_s2] sm:$0xf]  ;;  %v42_v18 = vld [vmem:[%s4646_s2 + $0x50] sm:$0xff]  ;;  %vm201_vm4 = vcmask 523264   ;;  %s30_s24 = sld [smem:[#allocation2]] }
  0x13   :  { %3475 = vmatpush1.bf16.msra.mxu1 %v3916_v8  ;;  %v57_v16 = vld [vmem:[%s4644_s0] sm:$0xff]  ;;  %v3943_v17 = vpack.c.bf16 %v45_v13, %v43_v12  ;;  %3256 = vmatprep.subr.msk.mxu0 %vm92_vm0, %v65_v15  ;;  %v58_v20 = vld [vmem:[%s4644_s0 + $0x8] sm:$0xff]  ;;  %v47_v21 = vld [vmem:[%s4646_s2 + $0x78] sm:$0xff]  ;;  %s3039_s9 = sld [smem:[#allocation2 + $0x1]]  ;;  %s3864_s16 = smov 120  }
  0x14   :  { %3477 = vmatprep.subr.bf16.mxu1 %v3918_v9  ;;  %v44_v19 = vld [vmem:[%s4646_s2 + $0x60] sm:$0xff]  ;;  %3257 = vmatpush3.msk.msra.mxu0 %vm92_vm0, %v65_v15  ;;  %v49_v22 = vld [vmem:[%s4646_s2 + $0x88] sm:$0xff]  ;;  %v55_v23 = vld [vmem:[%s4646_s2 + $0x230] ss:$0 sm:$0xff]  ;;  %s3865_s3 = smov 4   ;;  %s3866_s29 = smov 116  }
  0x15   :  { %3258 = vmatprep.mubr.msk.f32.mxu0 %vm67_vm1, %v57_v16  ;;  %284 = vrot.lane.b32.xlu0 %v55_v23, %s3859_s28  ;;  %v3967_v24 = vpack.c.bf16 %v44_v19, %v42_v18  ;;  %v3970_v25 = vpack.c.bf16 %v49_v22, %v47_v21  ;;  %v46_v26 = vld [vmem:[%s4646_s2 + $0x70] sm:$0xff]  ;;  %v48_v27 = vld [vmem:[%s4646_s2 + $0x80] sm:$0xff]  ;;  %v60_v53 = vld [vmem:[%s4644_s0 + $0x18] sm:$0xff]  ;;  %s3040_s14 = sld [smem:[#allocation2 + $0x2]] }
  0x16   :  { %3259 = vmatmul.mubr.msk.f32.vlgmr.msra.gmra.mrb[0].mxu0 %vm67_vm1, %v58_v20  ;;  %v3979_v28 = vpack.c.bf16 %v48_v27, %v46_v26  ;;  %v4002_v35 = vld [vmem:[%s4646_s2 + $0x220] ss:$0 sm:$0xff]  ;;  %v50_v47 = vld [vmem:[%s4646_s2 + $0x90] sm:$0xff]  ;;  %3488 = vmatprep.subr.bf16.mxu0 %v3861_v51  ;;  %v62_v58 = vld [vmem:[%s4644_s0 + $0x28] sm:$0xff] }
  0x17   :  { %3479 = vmatpush1.bf16.msra.mxu1 %v3934_v14  ;;  %v51_v48 = vld [vmem:[%s4646_s2 + $0xa0] sm:$0xff]  ;;  %v59_v49 = vld [vmem:[%s4644_s0 + $0x10] sm:$0xff]  ;;  %v64_v60 = vld [vmem:[%s4644_s0 + $0x38] sm:$0xff] }
  0x18   :  { %3481 = vmatprep.subr.bf16.mxu1 %v3943_v17  ;;  %v56_v50 = vld [vmem:[%s4646_s2 + $0x250] ss:$0 sm:$0xff]  ;;  %v4020_v52 = vpack.c.bf16 %v51_v48, %v50_v47  ;;  %3261 = vmatprep.mubr.msk.f32.mxu0 %vm67_vm1, %v59_v49  ;;  %v61_v54 = vld [vmem:[%s4644_s0 + $0x20] sm:$0xff] }
  0x19   :  { %v52_v55 = vld [vmem:[%s4646_s2 + $0xb0] sm:$0xff]  ;;  %v53_v56 = vld [vmem:[%s4646_s2 + $0xc0] sm:$0xff] }
  0x1a   :  { %3490 = vmatpush3.bf16.msra.mxu0 %v4020_v52  ;;  %v4037_v57 = vpack.c.bf16 %v53_v56, %v52_v55  ;;  %v63_v59 = vld [vmem:[%s4644_s0 + $0x30] sm:$0xff]  ;;  %v4091_v16 = vld [vmem:[%s4646_s2 + $0x240] ss:$0 sm:$0xff] }
  0x1b   :  { %3483 = vmatpush1.bf16.msra.mxu1 %v3967_v24  ;;  %3262 = vmatmul.mubr.msk.f32.gmra.mrb[2].mxu0 %vm67_vm1, %v60_v53 }
  0x1c   :  { %3485 = vmatprep.subr.bf16.mxu1 %v3970_v25  ;;  %3491 = vmatprep.subr.bf16.mxu0 %v3861_v51 }
  0x1d   :  { %3264 = vmatprep.mubr.msk.f32.mxu0 %vm67_vm1, %v61_v54 }
  0x1e   :  { %3493 = vmatpush3.bf16.msra.mxu0 %v4037_v57 }
  0x1f   :  { %3487 = vmatpush1.bf16.msra.mxu1 %v3979_v28  ;;  %3265 = vmatmul.mubr.msk.f32.gmra.mrb[4].mxu0 %vm67_vm1, %v62_v58 }
  0x20   :  { %3495 = vmatprep.subr.bf16.mxu1 %v3904_v3  ;;  %3510 = vmatprep.subr.bf16.mxu0 %v3861_v51 }
  0x21   :  { %3267 = vmatprep.mubr.msk.f32.mxu0 %vm67_vm1, %v63_v59 }
  0x22   :  { %270 = vmatmul.mubr.f32.vlgmr.msra.gmra.mrb[0].mxu1 %v3858_v7 }
  0x23   :  { %3497 = vmatpush1.bf16.msra.mxu1 %v3916_v8  ;;  %491 = vmatprep.mubr.f32.mxu1 %v3858_v7 }
  0x24   :  { %3499 = vmatprep.subr.bf16.mxu1 %v3918_v9  ;;  %3268 = vmatmul.mubr.msk.f32.gmra.mrb[6].mxu0 %vm67_vm1, %v64_v60 }
  0x25   :  { %3278 = vmatprep.mubr.msk.f32.mxu0 %vm3863_vm2, %v3858_v7 }
  0x27   :  { %3501 = vmatpush1.bf16.msra.mxu1 %v3934_v14 }
  0x28   :  { %3503 = vmatprep.subr.bf16.mxu1 %v3943_v17 }
  0x2b   :  { %3505 = vmatpush1.bf16.msra.mxu1 %v3967_v24 }
  0x2c   :  { %3507 = vmatprep.subr.bf16.mxu1 %v3970_v25 }
  0x2f   :  { %3509 = vmatpush1.bf16.msra.mxu1 %v3979_v28 }
  0x30   :  { %3532 = vmatprep.subr.bf16.mxu1 %v3861_v51 }
  0x87   :  { %v3995_v31 = vpop.permute.xlu0 %284 }
  0xe9   :  { %v3993_v29 = vpop.f32.mrb[0].mxu0 }
  0xea   :  { %v162_v30 = vpop.f32.mrb[1].mxu0  ;;  %v168_v49 = vadd.f32 %v3993_v29, %v4002_v35 }
  0xeb   :  { %v163_v36 = vadd.f32 %v162_v30, %v4002_v35 }
  0xee   :  { %v4069_v5 = vpop.f32.mrb[2].mxu0 }
  0xef   :  { %v4071_v6 = vpop.f32.mrb[3].mxu0 }
  0xf2   :  { %v4073_v10 = vpop.f32.mrb[4].mxu0 }
  0xf3   :  { %v4075_v11 = vpop.f32.mrb[5].mxu0 }
  0xf5   :  { %v271_v32 = vpop.f32.mrb[0].mxu1 }
  0xf6   :  { %v287_v33 = vadd.f32 %v3995_v31, %v271_v32  ;;  %v273_v34 = vpop.f32.mrb[1].mxu1  ;;  %v276_v37 = vadd.f32 %v271_v32, %v163_v36 }
  0xf7   :  { %v4077_v12 = vpop.f32.mrb[6].mxu0 }
  0xf8   :  { %289 = vrot.lane.b32.xlu0 %v287_v33, %s3859_s28  ;;  %v3051_v38 = vmul.f32 -1.442695, %v276_v37  ;;  %v4079_v13 = vpop.f32.mrb[7].mxu0 }
  0xfa   :  { %3698 = vpow2.f32 %v3051_v38 }
 0x104   :  { %v3699_v39 = vpop.eup %3698 }
 0x105   :  { %v280_v40 = vadd.f32 1.0, %v3699_v39 }
 0x107   :  { %3700 = vrcp.f32 %v280_v40 }
 0x111   :  { %v3701_v41 = vpop.eup %3700 }
 0x112   :  { %v299_v61 = vsub.f32 1.0, %v3701_v41  ;;  %v305_v63 = vmul.f32 0.0, %v3701_v41 }
 0x16a   :  { %v290_v42 = vpop.permute.xlu0 %289 }
 0x16b   :  { %v292_v43 = vmul.f32 %v3701_v41, %v290_v42 }
 0x16d   :  { %294 = vrot.lane.b32.xlu1 %v292_v43, %s3859_s28 }
 0x1df   :  { %v295_v44 = vpop.permute.xlu1 %294 }
 0x1e0   :  { %v297_v45 = vadd.f32 %v295_v44, %v163_v36 }
 0x1e2   :  { %3702 = vtanh.f32 %v297_v45 }
 0x1ec   :  { %v3703_v46 = vpop.eup %3702 }
 0x1ed   :  { %301 = vrot.lane.b32.xlu1 %v3703_v46, %s3860_s15 }
 0x1f1   :  { %399 = vrot.lane.b32.xlu1 %v56_v50, %s3862_s25 }
 0x1f5   :  { %387 = vrot.lane.b32.xlu1 %v273_v34, %s3862_s25 }
 0x25f   :  { %v302_v62 = vpop.permute.xlu1 %301 }
 0x260   :  { %v304_v0 = vmul.f32 %v302_v62, %v299_v61 }
 0x262   :  { %v4060_v1 = vadd.f32 %v305_v63, %v304_v0 }
 0x263   :  { %v4064_v2 = vpop.permute.xlu1 %399 }
 0x264   :  { %308 = vrot.lane.b32.xlu0 %v4060_v1, %s3860_s15  ;;  %v402_v4 = vadd.f32 %v4064_v2, %v273_v34 }
 0x267   :  { %v388_v20 = vpop.permute.xlu1 %387 }
 0x268   :  { %385 = vrot.lane.b32.xlu0 %v271_v32, %s3862_s25 }
 0x26c   :  { %404 = vrot.lane.b32.xlu0 %v402_v4, %s3860_s15 }
 0x2d6   :  { %v309_v15 = vpop.permute.xlu0 %308 }
 0x2d7   :  { %3279 = vmatmul.mubr.msk.f32.vlgmr.msra.gmra.mrb[8].mxu0 %vm310_vm3, %v309_v15 }
 0x2d8   :  { %3512 = vmatpush3.bf16.msra.mxu0 %v4020_v52  ;;  %3289 = vmatprep.mubr.msk.f32.mxu0 %vm3863_vm2, %v3858_v7 }
 0x2d9   :  { %3513 = vmatprep.subr.bf16.mxu0 %v3861_v51 }
 0x2da   :  { %v386_v18 = vpop.permute.xlu0 %385 }
 0x2db   :  { %v389_v23 = vsel %vm310_vm3, %v386_v18, %v388_v20 }
 0x2dc   :  { %3515 = vmatpush3.bf16.msra.mxu0 %v4037_v57 }
 0x2dd   :  { %3517 = vmatprep.subr.bf16.mxu0 %v3904_v3 }
 0x2de   :  { %v405_v34 = vpop.permute.xlu0 %404 }
 0x3aa   :  { %v379_v19 = vpop.f32.mrb[8].mxu0 }
 0x3ab   :  { %v380_v21 = vadd.f32 %v379_v19, %v4091_v16  ;;  %v3280_v22 = vpop.f32.mrb[9].mxu0 }
 0x3ad   :  { %v391_v26 = vadd.f32 %v389_v23, %v380_v21 }
 0x3af   :  { %v3053_v27 = vmul.f32 -1.442695, %v391_v26 }
 0x3b1   :  { %3704 = vpow2.f32 %v3053_v27 }
 0x3bb   :  { %v3705_v30 = vpop.eup %3704 }
 0x3bc   :  { %v395_v32 = vadd.f32 1.0, %v3705_v30 }
 0x3be   :  { %3706 = vrcp.f32 %v395_v32 }
 0x3c8   :  { %v3707_v33 = vpop.eup %3706 }
 0x3c9   :  { %v407_v36 = vmul.f32 %v3707_v33, %v405_v34  ;;  %v414_v40 = vsub.f32 1.0, %v3707_v33  ;;  %v420_v42 = vmul.f32 0.0, %v3707_v33 }
 0x3cb   :  { %409 = vrot.lane.b32.xlu1 %v407_v36, %s3859_s28 }
 0x43d   :  { %v410_v37 = vpop.permute.xlu1 %409 }
 0x43e   :  { %v412_v38 = vadd.f32 %v410_v37, %v380_v21 }
 0x440   :  { %3708 = vtanh.f32 %v412_v38 }
 0x44a   :  { %v3709_v39 = vpop.eup %3708 }
 0x44b   :  { %416 = vrot.lane.b32.xlu0 %v3709_v39, %s3860_s15 }
 0x4bd   :  { %v417_v41 = vpop.permute.xlu0 %416 }
 0x4be   :  { %v419_v43 = vmul.f32 %v417_v41, %v414_v40 }
 0x4c0   :  { %v4097_v44 = vadd.f32 %v420_v42, %v419_v43 }
 0x4c2   :  { %v423_v45 = vsel %vm310_vm3, %v309_v15, %v4097_v44 }
 0x4c3   :  { %3054 = vmatmul.mubr.msk.f32.vlgmr.msra.gmra.mrb[2].mxu1 %vm201_vm4, %v423_v45 }
 0x4c4   :  { %3534 = vmatpush3.bf16.msra.mxu1 %v4020_v52  ;;  %3300 = vmatprep.mubr.msk.f32.mxu1 %vm3863_vm2, %v3858_v7 }
 0x4c5   :  { %3535 = vmatprep.subr.bf16.mxu1 %v3861_v51 }
 0x4c8   :  { %3537 = vmatpush3.bf16.msra.mxu1 %v4037_v57 }
 0x4c9   :  { %3539 = vmatprep.subr.bf16.mxu1 %v3904_v3 }
 0x596   :  { %v493_v46 = vpop.f32.mrb[2].mxu1 }
 0x597   :  { %v505_v47 = vadd.f32 %v493_v46, %v3995_v31  ;;  %v495_v48 = vpop.f32.mrb[3].mxu1  ;;  %v498_v50 = vadd.f32 %v493_v46, %v168_v49 }
 0x598   :  { %v615_v29 = vadd.f32 %v495_v48, %v4064_v2 }
 0x599   :  { %507 = vrot.lane.b32.xlu1 %v505_v47, %s3859_s28  ;;  %v3055_v53 = vmul.f32 -1.442695, %v498_v50 }
 0x59b   :  { %3710 = vpow2.f32 %v3055_v53  ;;  %v173_v53 = vadd.f32 %v4071_v6, %v4002_v35 }
 0x5a5   :  { %v3711_v54 = vpop.eup %3710 }
 0x5a6   :  { %v502_v55 = vadd.f32 1.0, %v3711_v54 }
 0x5a8   :  { %3712 = vrcp.f32 %v502_v55 }
 0x5b2   :  { %v3713_v56 = vpop.eup %3712 }
 0x5b3   :  { %v517_v63 = vsub.f32 1.0, %v3713_v56  ;;  %v523_v4 = vmul.f32 %v3713_v56, %v4060_v1 }
 0x60b   :  { %v508_v58 = vpop.permute.xlu1 %507 }
 0x60c   :  { %v510_v59 = vmul.f32 %v3713_v56, %v508_v58 }
 0x60e   :  { %512 = vrot.lane.b32.xlu0 %v510_v59, %s3859_s28 }
 0x680   :  { %v513_v60 = vpop.permute.xlu0 %512 }
 0x681   :  { %v515_v61 = vadd.f32 %v513_v60, %v168_v49 }
 0x683   :  { %3714 = vtanh.f32 %v515_v61 }
 0x68d   :  { %v3715_v62 = vpop.eup %3714 }
 0x68e   :  { %519 = vrot.lane.b32.xlu1 %v3715_v62, %s3860_s15 }
 0x692   :  { %602 = vrot.lane.b32.xlu1 %v493_v46, %s3862_s25 }
 0x696   :  { %617 = vrot.lane.b32.xlu1 %v615_v29, %s3860_s15 }
 0x700   :  { %v520_v0 = vpop.permute.xlu1 %519 }
 0x701   :  { %v522_v15 = vmul.f32 %v520_v0, %v517_v63 }
 0x703   :  { %v4118_v18 = vadd.f32 %v523_v4, %v522_v15 }
 0x704   :  { %v603_v21 = vpop.permute.xlu1 %602 }
 0x705   :  { %526 = vrot.lane.b32.xlu0 %v4118_v18, %s3860_s15 }
 0x708   :  { %v618_v36 = vpop.permute.xlu1 %617 }
 0x709   :  { %604 = vrot.lane.b32.xlu0 %v495_v48, %s3862_s25 }
 0x777   :  { %v527_v19 = vpop.permute.xlu0 %526 }
 0x778   :  { %3290 = vmatmul.mubr.msk.f32.vlgmr.msra.gmra.mrb[10].mxu0 %vm310_vm3, %v527_v19 }
 0x779   :  { %3519 = vmatpush1.bf16.msra.mxu0 %v3916_v8  ;;  %704 = vmatprep.mubr.f32.mxu0 %v3858_v7 }
 0x77a   :  { %3521 = vmatprep.subr.bf16.mxu0 %v3918_v9 }
 0x77b   :  { %v605_v1 = vpop.permute.xlu0 %604 }
 0x77c   :  { %v606_v26 = vsel %vm310_vm3, %v603_v21, %v605_v1 }
 0x77d   :  { %3523 = vmatpush1.bf16.msra.mxu0 %v3934_v14 }
 0x77e   :  { %3525 = vmatprep.subr.bf16.mxu0 %v3943_v17 }
 0x781   :  { %3527 = vmatpush1.bf16.msra.mxu0 %v3967_v24 }
 0x782   :  { %3529 = vmatprep.subr.bf16.mxu0 %v3970_v25 }
 0x785   :  { %3531 = vmatpush1.bf16.msra.mxu0 %v3979_v28 }
 0x786   :  { %3554 = vmatprep.subr.bf16.mxu0 %v3861_v51 }
 0x84b   :  { %v596_v20 = vpop.f32.mrb[10].mxu0 }
 0x84c   :  { %v597_v22 = vadd.f32 %v596_v20, %v4091_v16  ;;  %v3291_v23 = vpop.f32.mrb[11].mxu0 }
 0x84e   :  { %v608_v27 = vadd.f32 %v606_v26, %v597_v22 }
 0x850   :  { %v3057_v30 = vmul.f32 -1.442695, %v608_v27 }
 0x852   :  { %3716 = vpow2.f32 %v3057_v30 }
 0x85c   :  { %v3717_v32 = vpop.eup %3716 }
 0x85d   :  { %v612_v33 = vadd.f32 1.0, %v3717_v32 }
 0x85f   :  { %3718 = vrcp.f32 %v612_v33 }
 0x869   :  { %v3719_v34 = vpop.eup %3718 }
 0x86a   :  { %v620_v37 = vmul.f32 %v3719_v34, %v618_v36  ;;  %v627_v41 = vsub.f32 1.0, %v3719_v34  ;;  %v633_v43 = vmul.f32 %v3719_v34, %v4097_v44 }
 0x86c   :  { %622 = vrot.lane.b32.xlu0 %v620_v37, %s3859_s28 }
 0x8de   :  { %v623_v38 = vpop.permute.xlu0 %622 }
 0x8df   :  { %v625_v39 = vadd.f32 %v623_v38, %v597_v22 }
 0x8e1   :  { %3720 = vtanh.f32 %v625_v39 }
 0x8eb   :  { %v3721_v40 = vpop.eup %3720 }
 0x8ec   :  { %629 = vrot.lane.b32.xlu1 %v3721_v40, %s3860_s15 }
 0x95e   :  { %v630_v42 = vpop.permute.xlu1 %629 }
 0x95f   :  { %v632_v45 = vmul.f32 %v630_v42, %v627_v41 }
 0x961   :  { %v4138_v46 = vadd.f32 %v633_v43, %v632_v45 }
 0x963   :  { %v636_v47 = vsel %vm310_vm3, %v527_v19, %v4138_v46 }
 0x964   :  { %3058 = vmatmul.mubr.msk.f32.vlgmr.msra.gmra.mrb[12].mxu0 %vm201_vm4, %v636_v47 }
 0x965   :  { %3556 = vmatpush3.bf16.msra.mxu0 %v4020_v52  ;;  %3311 = vmatprep.mubr.msk.f32.mxu0 %vm3863_vm2, %v3858_v7 }
 0x966   :  { %3557 = vmatprep.subr.bf16.mxu0 %v3861_v51 }
 0x969   :  { %3559 = vmatpush3.bf16.msra.mxu0 %v4037_v57 }
 0x96a   :  { %3561 = vmatprep.subr.bf16.mxu0 %v3904_v3 }
 0xa37   :  { %v706_v48 = vpop.f32.mrb[12].mxu0 }
 0xa38   :  { %v718_v49 = vadd.f32 %v706_v48, %v3995_v31  ;;  %v708_v50 = vpop.f32.mrb[13].mxu0  ;;  %v711_v54 = vadd.f32 %v706_v48, %v173_v53 }
 0xa39   :  { %v828_v6 = vadd.f32 %v708_v50, %v4064_v2 }
 0xa3a   :  { %720 = vrot.lane.b32.xlu0 %v718_v49, %s3859_s28  ;;  %v3059_v55 = vmul.f32 -1.442695, %v711_v54 }
 0xa3c   :  { %3722 = vpow2.f32 %v3059_v55  ;;  %v178_v55 = vadd.f32 %v4069_v5, %v4002_v35 }
 0xa46   :  { %v3723_v56 = vpop.eup %3722 }
 0xa47   :  { %v715_v58 = vadd.f32 1.0, %v3723_v56 }
 0xa49   :  { %3724 = vrcp.f32 %v715_v58 }
 0xa53   :  { %v3725_v59 = vpop.eup %3724 }
 0xa54   :  { %v730_v0 = vsub.f32 1.0, %v3725_v59  ;;  %v736_v15 = vmul.f32 %v3725_v59, %v4118_v18 }
 0xaac   :  { %v721_v60 = vpop.permute.xlu0 %720 }
 0xaad   :  { %v723_v61 = vmul.f32 %v3725_v59, %v721_v60 }
 0xaaf   :  { %725 = vrot.lane.b32.xlu1 %v723_v61, %s3859_s28 }
 0xb21   :  { %v726_v62 = vpop.permute.xlu1 %725 }
 0xb22   :  { %v728_v29 = vadd.f32 %v726_v62, %v173_v53 }
 0xb24   :  { %3726 = vtanh.f32 %v728_v29 }
 0xb2e   :  { %v3727_v63 = vpop.eup %3726 }
 0xb2f   :  { %732 = vrot.lane.b32.xlu0 %v3727_v63, %s3860_s15 }
 0xb33   :  { %815 = vrot.lane.b32.xlu0 %v706_v48, %s3862_s25 }
 0xb37   :  { %830 = vrot.lane.b32.xlu0 %v828_v6, %s3860_s15 }
 0xba1   :  { %v733_v4 = vpop.permute.xlu0 %732 }
 0xba2   :  { %v735_v19 = vmul.f32 %v733_v4, %v730_v0 }
 0xba4   :  { %v4159_v1 = vadd.f32 %v736_v15, %v735_v19 }
 0xba5   :  { %v816_v22 = vpop.permute.xlu0 %815 }
 0xba6   :  { %739 = vrot.lane.b32.xlu1 %v4159_v1, %s3860_s15 }
 0xba9   :  { %v831_v37 = vpop.permute.xlu0 %830 }
 0xbaa   :  { %817 = vrot.lane.b32.xlu1 %v708_v50, %s3862_s25 }
 0xc18   :  { %v740_v20 = vpop.permute.xlu1 %739 }
 0xc19   :  { %3301 = vmatmul.mubr.msk.f32.vlgmr.msra.gmra.mrb[4].mxu1 %vm310_vm3, %v740_v20 }
 0xc1a   :  { %3541 = vmatpush1.bf16.msra.mxu1 %v3916_v8  ;;  %917 = vmatprep.mubr.f32.mxu1 %v3858_v7 }
 0xc1b   :  { %3543 = vmatprep.subr.bf16.mxu1 %v3918_v9 }
 0xc1c   :  { %v818_v18 = vpop.permute.xlu1 %817 }
 0xc1d   :  { %v819_v27 = vsel %vm310_vm3, %v816_v22, %v818_v18 }
 0xc1e   :  { %3545 = vmatpush1.bf16.msra.mxu1 %v3934_v14 }
 0xc1f   :  { %3547 = vmatprep.subr.bf16.mxu1 %v3943_v17 }
 0xc22   :  { %3549 = vmatpush1.bf16.msra.mxu1 %v3967_v24 }
 0xc23   :  { %3551 = vmatprep.subr.bf16.mxu1 %v3970_v25 }
 0xc26   :  { %3553 = vmatpush1.bf16.msra.mxu1 %v3979_v28 }
 0xc27   :  { %3576 = vmatprep.subr.bf16.mxu1 %v3861_v51 }
 0xcec   :  { %v809_v21 = vpop.f32.mrb[4].mxu1 }
 0xced   :  { %v810_v23 = vadd.f32 %v809_v21, %v4091_v16  ;;  %v3302_v26 = vpop.f32.mrb[5].mxu1 }
 0xcef   :  { %v821_v30 = vadd.f32 %v819_v27, %v810_v23 }
 0xcf1   :  { %v3061_v32 = vmul.f32 -1.442695, %v821_v30 }
 0xcf3   :  { %3728 = vpow2.f32 %v3061_v32 }
 0xcfd   :  { %v3729_v33 = vpop.eup %3728 }
 0xcfe   :  { %v825_v34 = vadd.f32 1.0, %v3729_v33 }
 0xd00   :  { %3730 = vrcp.f32 %v825_v34 }
 0xd0a   :  { %v3731_v36 = vpop.eup %3730 }
 0xd0b   :  { %v833_v38 = vmul.f32 %v3731_v36, %v831_v37  ;;  %v840_v42 = vsub.f32 1.0, %v3731_v36  ;;  %v846_v45 = vmul.f32 %v3731_v36, %v4138_v46 }
 0xd0d   :  { %835 = vrot.lane.b32.xlu1 %v833_v38, %s3859_s28 }
 0xd7f   :  { %v836_v39 = vpop.permute.xlu1 %835 }
 0xd80   :  { %v838_v40 = vadd.f32 %v836_v39, %v810_v23 }
 0xd82   :  { %3732 = vtanh.f32 %v838_v40 }
 0xd8c   :  { %v3733_v41 = vpop.eup %3732 }
 0xd8d   :  { %842 = vrot.lane.b32.xlu0 %v3733_v41, %s3860_s15 }
 0xdff   :  { %v843_v43 = vpop.permute.xlu0 %842 }
 0xe00   :  { %v845_v47 = vmul.f32 %v843_v43, %v840_v42 }
 0xe02   :  { %v4179_v48 = vadd.f32 %v846_v45, %v845_v47 }
 0xe04   :  { %v849_v49 = vsel %vm310_vm3, %v740_v20, %v4179_v48 }
 0xe05   :  { %3062 = vmatmul.mubr.msk.f32.vlgmr.msra.gmra.mrb[6].mxu1 %vm201_vm4, %v849_v49 }
 0xe06   :  { %3578 = vmatpush3.bf16.msra.mxu1 %v4020_v52  ;;  %3322 = vmatprep.mubr.msk.f32.mxu1 %vm3863_vm2, %v3858_v7 }
 0xe07   :  { %3579 = vmatprep.subr.bf16.mxu1 %v3861_v51 }
 0xe0a   :  { %3581 = vmatpush3.bf16.msra.mxu1 %v4037_v57 }
 0xe0b   :  { %3583 = vmatprep.subr.bf16.mxu1 %v3904_v3 }
 0xed8   :  { %v919_v50 = vpop.f32.mrb[6].mxu1 }
 0xed9   :  { %v931_v53 = vadd.f32 %v919_v50, %v3995_v31  ;;  %v921_v54 = vpop.f32.mrb[7].mxu1  ;;  %v924_v56 = vadd.f32 %v919_v50, %v178_v55 }
 0xeda   :  { %v1041_v5 = vadd.f32 %v921_v54, %v4064_v2 }
 0xedb   :  { %933 = vrot.lane.b32.xlu1 %v931_v53, %s3859_s28  ;;  %v3063_v58 = vmul.f32 -1.442695, %v924_v56 }
 0xedd   :  { %3734 = vpow2.f32 %v3063_v58  ;;  %v183_v58 = vadd.f32 %v4075_v11, %v4002_v35 }
 0xee7   :  { %v3735_v59 = vpop.eup %3734 }
 0xee8   :  { %v928_v60 = vadd.f32 1.0, %v3735_v59 }
 0xeea   :  { %3736 = vrcp.f32 %v928_v60 }
 0xef4   :  { %v3737_v61 = vpop.eup %3736 }
 0xef5   :  { %v943_v4 = vsub.f32 1.0, %v3737_v61  ;;  %v949_v19 = vmul.f32 %v3737_v61, %v4159_v1 }
 0xf4d   :  { %v934_v62 = vpop.permute.xlu1 %933 }
 0xf4e   :  { %v936_v29 = vmul.f32 %v3737_v61, %v934_v62 }
 0xf50   :  { %938 = vrot.lane.b32.xlu0 %v936_v29, %s3859_s28 }
 0xfc2   :  { %v939_v63 = vpop.permute.xlu0 %938 }
 0xfc3   :  { %v941_v6 = vadd.f32 %v939_v63, %v178_v55 }
 0xfc5   :  { %3738 = vtanh.f32 %v941_v6 }
 0xfcf   :  { %v3739_v0 = vpop.eup %3738 }
 0xfd0   :  { %945 = vrot.lane.b32.xlu1 %v3739_v0, %s3860_s15 }
 0xfd4   :  { %1028 = vrot.lane.b32.xlu1 %v919_v50, %s3862_s25 }
 0xfd8   :  { %1043 = vrot.lane.b32.xlu1 %v1041_v5, %s3860_s15 }
0x1042   :  { %v946_v15 = vpop.permute.xlu1 %945 }
0x1043   :  { %v948_v20 = vmul.f32 %v946_v15, %v943_v4 }
0x1045   :  { %v4200_v18 = vadd.f32 %v949_v19, %v948_v20 }
0x1046   :  { %v1029_v23 = vpop.permute.xlu1 %1028 }
0x1047   :  { %952 = vrot.lane.b32.xlu0 %v4200_v18, %s3860_s15 }
0x104a   :  { %v1044_v38 = vpop.permute.xlu1 %1043 }
0x104b   :  { %1030 = vrot.lane.b32.xlu0 %v921_v54, %s3862_s25 }
0x10b9   :  { %v953_v21 = vpop.permute.xlu0 %952 }
0x10ba   :  { %3312 = vmatmul.mubr.msk.f32.vlgmr.msra.gmra.mrb[14].mxu0 %vm310_vm3, %v953_v21 }
0x10bb   :  { %3563 = vmatpush1.bf16.msra.mxu0 %v3916_v8  ;;  %1130 = vmatprep.mubr.f32.mxu0 %v3858_v7 }
0x10bc   :  { %3565 = vmatprep.subr.bf16.mxu0 %v3918_v9 }
0x10bd   :  { %v1031_v1 = vpop.permute.xlu0 %1030 }
0x10be   :  { %v1032_v30 = vsel %vm310_vm3, %v1029_v23, %v1031_v1 }
0x10bf   :  { %3567 = vmatpush1.bf16.msra.mxu0 %v3934_v14 }
0x10c0   :  { %3569 = vmatprep.subr.bf16.mxu0 %v3943_v17 }
0x10c3   :  { %3571 = vmatpush1.bf16.msra.mxu0 %v3967_v24 }
0x10c4   :  { %3573 = vmatprep.subr.bf16.mxu0 %v3970_v25 }
0x10c7   :  { %3575 = vmatpush1.bf16.msra.mxu0 %v3979_v28 }
0x10c8   :  { %3598 = vmatprep.subr.bf16.mxu0 %v3861_v51 }
0x118d   :  { %v1022_v22 = vpop.f32.mrb[14].mxu0 }
0x118e   :  { %v1023_v26 = vadd.f32 %v1022_v22, %v4091_v16  ;;  %v3313_v27 = vpop.f32.mrb[15].mxu0 }
0x1190   :  { %v1034_v32 = vadd.f32 %v1032_v30, %v1023_v26 }
0x1192   :  { %v3065_v33 = vmul.f32 -1.442695, %v1034_v32 }
0x1194   :  { %3740 = vpow2.f32 %v3065_v33 }
0x119e   :  { %v3741_v34 = vpop.eup %3740 }
0x119f   :  { %v1038_v36 = vadd.f32 1.0, %v3741_v34 }
0x11a1   :  { %3742 = vrcp.f32 %v1038_v36 }
0x11ab   :  { %v3743_v37 = vpop.eup %3742 }
0x11ac   :  { %v1046_v39 = vmul.f32 %v3743_v37, %v1044_v38  ;;  %v1053_v43 = vsub.f32 1.0, %v3743_v37  ;;  %v1059_v47 = vmul.f32 %v3743_v37, %v4179_v48 }
0x11ae   :  { %1048 = vrot.lane.b32.xlu0 %v1046_v39, %s3859_s28 }
0x1220   :  { %v1049_v40 = vpop.permute.xlu0 %1048 }
0x1221   :  { %v1051_v41 = vadd.f32 %v1049_v40, %v1023_v26 }
0x1223   :  { %3744 = vtanh.f32 %v1051_v41 }
0x122d   :  { %v3745_v42 = vpop.eup %3744 }
0x122e   :  { %1055 = vrot.lane.b32.xlu1 %v3745_v42, %s3860_s15 }
0x12a0   :  { %v1056_v45 = vpop.permute.xlu1 %1055 }
0x12a1   :  { %v1058_v49 = vmul.f32 %v1056_v45, %v1053_v43 }
0x12a3   :  { %v4220_v50 = vadd.f32 %v1059_v47, %v1058_v49 }
0x12a5   :  { %v1062_v53 = vsel %vm310_vm3, %v953_v21, %v4220_v50 }
0x12a6   :  { %3066 = vmatmul.mubr.msk.f32.vlgmr.msra.gmra.mrb[16].mxu0 %vm201_vm4, %v1062_v53 }
0x12a7   :  { %3600 = vmatpush3.bf16.msra.mxu0 %v4020_v52  ;;  %3333 = vmatprep.mubr.msk.f32.mxu0 %vm3863_vm2, %v3858_v7 }
0x12a8   :  { %3601 = vmatprep.subr.bf16.mxu0 %v3861_v51 }
0x12ab   :  { %3603 = vmatpush3.bf16.msra.mxu0 %v4037_v57 }
0x12ac   :  { %3605 = vmatprep.subr.bf16.mxu0 %v3904_v3 }
0x1379   :  { %v1132_v54 = vpop.f32.mrb[16].mxu0 }
0x137a   :  { %v1144_v55 = vadd.f32 %v1132_v54, %v3995_v31  ;;  %v1134_v56 = vpop.f32.mrb[17].mxu0  ;;  %v1137_v59 = vadd.f32 %v1132_v54, %v183_v58 }
0x137b   :  { %v1254_v11 = vadd.f32 %v1134_v56, %v4064_v2 }
0x137c   :  { %1146 = vrot.lane.b32.xlu0 %v1144_v55, %s3859_s28  ;;  %v3067_v60 = vmul.f32 -1.442695, %v1137_v59 }
0x137e   :  { %3746 = vpow2.f32 %v3067_v60  ;;  %v188_v60 = vadd.f32 %v4073_v10, %v4002_v35 }
0x1388   :  { %v3747_v61 = vpop.eup %3746 }
0x1389   :  { %v1141_v62 = vadd.f32 1.0, %v3747_v61 }
0x138b   :  { %3748 = vrcp.f32 %v1141_v62 }
0x1395   :  { %v3749_v29 = vpop.eup %3748 }
0x1396   :  { %v1156_v15 = vsub.f32 1.0, %v3749_v29  ;;  %v1162_v20 = vmul.f32 %v3749_v29, %v4200_v18 }
0x13ee   :  { %v1147_v63 = vpop.permute.xlu0 %1146 }
0x13ef   :  { %v1149_v6 = vmul.f32 %v3749_v29, %v1147_v63 }
0x13f1   :  { %1151 = vrot.lane.b32.xlu1 %v1149_v6, %s3859_s28 }
0x1463   :  { %v1152_v0 = vpop.permute.xlu1 %1151 }
0x1464   :  { %v1154_v5 = vadd.f32 %v1152_v0, %v183_v58 }
0x1466   :  { %3750 = vtanh.f32 %v1154_v5 }
0x1470   :  { %v3751_v4 = vpop.eup %3750 }
0x1471   :  { %1158 = vrot.lane.b32.xlu0 %v3751_v4, %s3860_s15 }
0x1475   :  { %1241 = vrot.lane.b32.xlu0 %v1132_v54, %s3862_s25 }
0x1479   :  { %1256 = vrot.lane.b32.xlu0 %v1254_v11, %s3860_s15 }
0x14e3   :  { %v1159_v19 = vpop.permute.xlu0 %1158 }
0x14e4   :  { %v1161_v21 = vmul.f32 %v1159_v19, %v1156_v15 }
0x14e6   :  { %v4241_v1 = vadd.f32 %v1162_v20, %v1161_v21 }
0x14e7   :  { %v1242_v26 = vpop.permute.xlu0 %1241 }
0x14e8   :  { %1165 = vrot.lane.b32.xlu1 %v4241_v1, %s3860_s15 }
0x14eb   :  { %v1257_v39 = vpop.permute.xlu0 %1256 }
0x14ec   :  { %1243 = vrot.lane.b32.xlu1 %v1134_v56, %s3862_s25 }
0x155a   :  { %v1166_v22 = vpop.permute.xlu1 %1165 }
0x155b   :  { %3323 = vmatmul.mubr.msk.f32.vlgmr.msra.gmra.mrb[8].mxu1 %vm310_vm3, %v1166_v22 }
0x155c   :  { %3585 = vmatpush1.bf16.msra.mxu1 %v3916_v8  ;;  %1343 = vmatprep.mubr.f32.mxu1 %v3858_v7 }
0x155d   :  { %3587 = vmatprep.subr.bf16.mxu1 %v3918_v9 }
0x155e   :  { %v1244_v18 = vpop.permute.xlu1 %1243 }
0x155f   :  { %v1245_v32 = vsel %vm310_vm3, %v1242_v26, %v1244_v18 }
0x1560   :  { %3589 = vmatpush1.bf16.msra.mxu1 %v3934_v14 }
0x1561   :  { %3591 = vmatprep.subr.bf16.mxu1 %v3943_v17 }
0x1564   :  { %3593 = vmatpush1.bf16.msra.mxu1 %v3967_v24 }
0x1565   :  { %3595 = vmatprep.subr.bf16.mxu1 %v3970_v25 }
0x1568   :  { %3597 = vmatpush1.bf16.msra.mxu1 %v3979_v28 }
0x1569   :  { %3620 = vmatprep.subr.bf16.mxu1 %v3861_v51 }
0x162e   :  { %v1235_v23 = vpop.f32.mrb[8].mxu1 }
0x162f   :  { %v1236_v27 = vadd.f32 %v1235_v23, %v4091_v16  ;;  %v3324_v30 = vpop.f32.mrb[9].mxu1 }
0x1631   :  { %v1247_v33 = vadd.f32 %v1245_v32, %v1236_v27 }
0x1633   :  { %v3069_v34 = vmul.f32 -1.442695, %v1247_v33 }
0x1635   :  { %3752 = vpow2.f32 %v3069_v34 }
0x163f   :  { %v3753_v36 = vpop.eup %3752 }
0x1640   :  { %v1251_v37 = vadd.f32 1.0, %v3753_v36 }
0x1642   :  { %3754 = vrcp.f32 %v1251_v37 }
0x164c   :  { %v3755_v38 = vpop.eup %3754 }
0x164d   :  { %v1259_v40 = vmul.f32 %v3755_v38, %v1257_v39  ;;  %v1266_v45 = vsub.f32 1.0, %v3755_v38  ;;  %v1272_v49 = vmul.f32 %v3755_v38, %v4220_v50 }
0x164f   :  { %1261 = vrot.lane.b32.xlu1 %v1259_v40, %s3859_s28 }
0x16c1   :  { %v1262_v41 = vpop.permute.xlu1 %1261 }
0x16c2   :  { %v1264_v42 = vadd.f32 %v1262_v41, %v1236_v27 }
0x16c4   :  { %3756 = vtanh.f32 %v1264_v42 }
0x16ce   :  { %v3757_v43 = vpop.eup %3756 }
0x16cf   :  { %1268 = vrot.lane.b32.xlu0 %v3757_v43, %s3860_s15 }
0x1741   :  { %v1269_v47 = vpop.permute.xlu0 %1268 }
0x1742   :  { %v1271_v53 = vmul.f32 %v1269_v47, %v1266_v45 }
0x1744   :  { %v4261_v54 = vadd.f32 %v1272_v49, %v1271_v53 }
0x1746   :  { %v1275_v55 = vsel %vm310_vm3, %v1166_v22, %v4261_v54 }
0x1747   :  { %3070 = vmatmul.mubr.msk.f32.vlgmr.msra.gmra.mrb[10].mxu1 %vm201_vm4, %v1275_v55 }
0x1748   :  { %3622 = vmatpush3.bf16.msra.mxu1 %v4020_v52  ;;  %3344 = vmatprep.mubr.msk.f32.mxu1 %vm3863_vm2, %v3858_v7 }
0x1749   :  { %3623 = vmatprep.subr.bf16.mxu1 %v3861_v51 }
0x174c   :  { %3625 = vmatpush3.bf16.msra.mxu1 %v4037_v57 }
0x174d   :  { %3627 = vmatprep.subr.bf16.mxu1 %v3904_v3 }
0x181a   :  { %v1345_v56 = vpop.f32.mrb[10].mxu1 }
0x181b   :  { %v1357_v58 = vadd.f32 %v1345_v56, %v3995_v31  ;;  %v1347_v59 = vpop.f32.mrb[11].mxu1  ;;  %v1350_v61 = vadd.f32 %v1345_v56, %v188_v60 }
0x181c   :  { %v1467_v10 = vadd.f32 %v1347_v59, %v4064_v2 }
0x181d   :  { %1359 = vrot.lane.b32.xlu1 %v1357_v58, %s3859_s28  ;;  %v3071_v62 = vmul.f32 -1.442695, %v1350_v61  ;;  %v193_v61 = vadd.f32 %v4079_v13, %v4002_v35 }
0x181f   :  { %3758 = vpow2.f32 %v3071_v62 }
0x1829   :  { %v3759_v29 = vpop.eup %3758 }
0x182a   :  { %v1354_v63 = vadd.f32 1.0, %v3759_v29 }
0x182c   :  { %3760 = vrcp.f32 %v1354_v63 }
0x1836   :  { %v3761_v6 = vpop.eup %3760 }
0x1837   :  { %v1369_v15 = vsub.f32 1.0, %v3761_v6  ;;  %v1375_v20 = vmul.f32 %v3761_v6, %v4241_v1 }
0x188f   :  { %v1360_v0 = vpop.permute.xlu1 %1359 }
0x1890   :  { %v1362_v5 = vmul.f32 %v3761_v6, %v1360_v0 }
0x1892   :  { %1364 = vrot.lane.b32.xlu0 %v1362_v5, %s3859_s28 }
0x1904   :  { %v1365_v3 = vpop.permute.xlu0 %1364 }
0x1905   :  { %v1367_v4 = vadd.f32 %v1365_v3, %v188_v60 }
0x1907   :  { %3762 = vtanh.f32 %v1367_v4 }
0x1911   :  { %v3763_v11 = vpop.eup %3762 }
0x1912   :  { %1371 = vrot.lane.b32.xlu1 %v3763_v11, %s3860_s15 }
0x1916   :  { %1454 = vrot.lane.b32.xlu1 %v1345_v56, %s3862_s25 }
0x191a   :  { %1469 = vrot.lane.b32.xlu1 %v1467_v10, %s3860_s15 }
0x1984   :  { %v1372_v19 = vpop.permute.xlu1 %1371 }
0x1985   :  { %v1374_v21 = vmul.f32 %v1372_v19, %v1369_v15 }
0x1987   :  { %v4282_v22 = vadd.f32 %v1375_v20, %v1374_v21 }
0x1988   :  { %v1455_v26 = vpop.permute.xlu1 %1454 }
0x1989   :  { %1378 = vrot.lane.b32.xlu0 %v4282_v22, %s3860_s15 }
0x198c   :  { %v1470_v39 = vpop.permute.xlu1 %1469 }
0x198d   :  { %1456 = vrot.lane.b32.xlu0 %v1347_v59, %s3862_s25 }
0x19fb   :  { %v1379_v18 = vpop.permute.xlu0 %1378 }
0x19fc   :  { %3334 = vmatmul.mubr.msk.f32.vlgmr.msra.gmra.mrb[18].mxu0 %vm310_vm3, %v1379_v18 }
0x19fd   :  { %3607 = vmatpush1.bf16.msra.mxu0 %v3916_v8  ;;  %1556 = vmatprep.mubr.f32.mxu0 %v3858_v7 }
0x19fe   :  { %3609 = vmatprep.subr.bf16.mxu0 %v3918_v9 }
0x19ff   :  { %v1457_v1 = vpop.permute.xlu0 %1456 }
0x1a00   :  { %v1458_v32 = vsel %vm310_vm3, %v1455_v26, %v1457_v1 }
0x1a01   :  { %3611 = vmatpush1.bf16.msra.mxu0 %v3934_v14 }
0x1a02   :  { %3613 = vmatprep.subr.bf16.mxu0 %v3943_v17 }
0x1a05   :  { %3615 = vmatpush1.bf16.msra.mxu0 %v3967_v24 }
0x1a06   :  { %3617 = vmatprep.subr.bf16.mxu0 %v3970_v25 }
0x1a09   :  { %3619 = vmatpush1.bf16.msra.mxu0 %v3979_v28 }
0x1a0a   :  { %3642 = vmatprep.subr.bf16.mxu0 %v3861_v51 }
0x1acf   :  { %v1448_v23 = vpop.f32.mrb[18].mxu0 }
0x1ad0   :  { %v1449_v27 = vadd.f32 %v1448_v23, %v4091_v16  ;;  %v3335_v30 = vpop.f32.mrb[19].mxu0 }
0x1ad2   :  { %v1460_v33 = vadd.f32 %v1458_v32, %v1449_v27 }
0x1ad4   :  { %v3073_v34 = vmul.f32 -1.442695, %v1460_v33 }
0x1ad6   :  { %3764 = vpow2.f32 %v3073_v34 }
0x1ae0   :  { %v3765_v36 = vpop.eup %3764 }
0x1ae1   :  { %v1464_v37 = vadd.f32 1.0, %v3765_v36 }
0x1ae3   :  { %3766 = vrcp.f32 %v1464_v37 }
0x1aed   :  { %v3767_v38 = vpop.eup %3766 }
0x1aee   :  { %v1472_v40 = vmul.f32 %v3767_v38, %v1470_v39  ;;  %v1479_v45 = vsub.f32 1.0, %v3767_v38  ;;  %v1485_v49 = vmul.f32 %v3767_v38, %v4261_v54 }
0x1af0   :  { %1474 = vrot.lane.b32.xlu0 %v1472_v40, %s3859_s28 }
0x1b62   :  { %v1475_v41 = vpop.permute.xlu0 %1474 }
0x1b63   :  { %v1477_v42 = vadd.f32 %v1475_v41, %v1449_v27 }
0x1b65   :  { %3768 = vtanh.f32 %v1477_v42  ;;  %v3842_v42 = vld [vmem:[%s4646_s2 + $0x220] ss:$0 sm:$0xff] }
0x1b6f   :  { %v3769_v43 = vpop.eup %3768 }
0x1b70   :  { %1481 = vrot.lane.b32.xlu1 %v3769_v43, %s3860_s15  ;;  %v198_v43 = vadd.f32 %v3842_v42, %v4077_v12 }
0x1be2   :  { %v1482_v47 = vpop.permute.xlu1 %1481 }
0x1be3   :  { %v1484_v53 = vmul.f32 %v1482_v47, %v1479_v45 }
0x1be5   :  { %v4302_v55 = vadd.f32 %v1485_v49, %v1484_v53 }
0x1be7   :  { %v1488_v56 = vsel %vm310_vm3, %v1379_v18, %v4302_v55 }
0x1be8   :  { %3074 = vmatmul.mubr.msk.f32.vlgmr.msra.gmra.mrb[20].mxu0 %vm201_vm4, %v1488_v56 }
0x1be9   :  { %3644 = vmatpush3.bf16.msra.mxu0 %v4020_v52  ;;  %3355 = vmatprep.mubr.msk.f32.mxu0 %vm3863_vm2, %v3858_v7 }
0x1bea   :  { %3645 = vmatprep.subr.bf16.mxu0 %v3861_v51 }
0x1bed   :  { %3647 = vmatpush3.bf16.msra.mxu0 %v4037_v57 }
0x1cbb   :  { %v1558_v58 = vpop.f32.mrb[20].mxu0 }
0x1cbc   :  { %v1570_v59 = vadd.f32 %v1558_v58, %v3995_v31  ;;  %v1560_v60 = vpop.f32.mrb[21].mxu0  ;;  %v1563_v62 = vadd.f32 %v1558_v58, %v193_v61 }
0x1cbd   :  { %v1680_v35 = vadd.f32 %v1560_v60, %v4064_v2 }
0x1cbe   :  { %1572 = vrot.lane.b32.xlu0 %v1570_v59, %s3859_s28  ;;  %v3075_v29 = vmul.f32 -1.442695, %v1563_v62 }
0x1cc0   :  { %3770 = vpow2.f32 %v3075_v29 }
0x1cca   :  { %v3771_v52 = vpop.eup %3770 }
0x1ccb   :  { %v1567_v63 = vadd.f32 1.0, %v3771_v52 }
0x1ccd   :  { %3772 = vrcp.f32 %v1567_v63 }
0x1cd7   :  { %v3773_v6 = vpop.eup %3772 }
0x1cd8   :  { %v1582_v13 = vsub.f32 1.0, %v3773_v6  ;;  %v1588_v11 = vmul.f32 %v3773_v6, %v4282_v22 }
0x1d30   :  { %v1573_v0 = vpop.permute.xlu0 %1572 }
0x1d31   :  { %v1575_v51 = vmul.f32 %v3773_v6, %v1573_v0 }
0x1d33   :  { %1577 = vrot.lane.b32.xlu1 %v1575_v51, %s3859_s28 }
0x1da5   :  { %v1578_v57 = vpop.permute.xlu1 %1577 }
0x1da6   :  { %v1580_v5 = vadd.f32 %v1578_v57, %v193_v61 }
0x1da8   :  { %3774 = vtanh.f32 %v1580_v5 }
0x1db2   :  { %v3775_v3 = vpop.eup %3774 }
0x1db3   :  { %1584 = vrot.lane.b32.xlu0 %v3775_v3, %s3860_s15 }
0x1db7   :  { %1667 = vrot.lane.b32.xlu0 %v1558_v58, %s3862_s25 }
0x1dbb   :  { %1682 = vrot.lane.b32.xlu0 %v1680_v35, %s3860_s15 }
0x1e25   :  { %v1585_v4 = vpop.permute.xlu0 %1584 }
0x1e26   :  { %v1587_v10 = vmul.f32 %v1585_v4, %v1582_v13 }
0x1e28   :  { %v4322_v15 = vadd.f32 %v1588_v11, %v1587_v10 }
0x1e29   :  { %v1668_v22 = vpop.permute.xlu0 %1667 }
0x1e2a   :  { %1591 = vrot.lane.b32.xlu1 %v4322_v15, %s3860_s15 }
0x1e2e   :  { %1669 = vrot.lane.b32.xlu1 %v1560_v60, %s3862_s25 }
0x1e9c   :  { %v1592_v19 = vpop.permute.xlu1 %1591 }
0x1e9d   :  { %3345 = vmatmul.mubr.msk.f32.vlgmr.msra.gmra.mrb[12].mxu1 %vm310_vm3, %v1592_v19 }
0x1e9e   :  { %3629 = vmatpush1.bf16.msra.mxu1 %v3916_v8  ;;  %1769 = vmatprep.mubr.f32.mxu1 %v3858_v7 }
0x1e9f   :  { %3631 = vmatprep.subr.bf16.mxu1 %v3918_v9 }
0x1ea0   :  { %v1670_v20 = vpop.permute.xlu1 %1669 }
0x1ea1   :  { %v1671_v1 = vsel %vm310_vm3, %v1668_v22, %v1670_v20 }
0x1ea2   :  { %3633 = vmatpush1.bf16.msra.mxu1 %v3934_v14 }
0x1ea3   :  { %3635 = vmatprep.subr.bf16.mxu1 %v3943_v17 }
0x1ea6   :  { %3637 = vmatpush1.bf16.msra.mxu1 %v3967_v24  ;;  %v1683_v24 = vpop.permute.xlu0 %1682 }
0x1ea7   :  { %3639 = vmatprep.subr.bf16.mxu1 %v3970_v25 }
0x1eaa   :  { %3641 = vmatpush1.bf16.msra.mxu1 %v3979_v28 }
0x1f70   :  { %v1661_v21 = vpop.f32.mrb[12].mxu1 }
0x1f71   :  { %v1662_v18 = vadd.f32 %v1661_v21, %v4091_v16  ;;  %v3346_v8 = vpop.f32.mrb[13].mxu1  ;;  %v1914_v21 = vld [vmem:[%s4646_s2 + $0xe0] sm:$0xff] }
0x1f73   :  { %v1673_v23 = vadd.f32 %v1671_v1, %v1662_v18 }
0x1f75   :  { %v3077_v9 = vmul.f32 -1.442695, %v1673_v23 }
0x1f77   :  { %3776 = vpow2.f32 %v3077_v9 }
0x1f81   :  { %v3777_v14 = vpop.eup %3776 }
0x1f82   :  { %v1677_v26 = vadd.f32 1.0, %v3777_v14 }
0x1f84   :  { %3778 = vrcp.f32 %v1677_v26 }
0x1f8e   :  { %v3779_v17 = vpop.eup %3778 }
0x1f8f   :  { %v1685_v27 = vmul.f32 %v3779_v17, %v1683_v24  ;;  %v1692_v32 = vsub.f32 1.0, %v3779_v17  ;;  %v1698_v34 = vmul.f32 %v3779_v17, %v4302_v55 }
0x1f91   :  { %1687 = vrot.lane.b32.xlu1 %v1685_v27, %s3859_s28 }
0x2003   :  { %v1688_v25 = vpop.permute.xlu1 %1687 }
0x2004   :  { %v1690_v28 = vadd.f32 %v1688_v25, %v1662_v18 }
0x2006   :  { %3780 = vtanh.f32 %v1690_v28 }
0x2010   :  { %v3781_v30 = vpop.eup %3780 }
0x2011   :  { %1694 = vrot.lane.b32.xlu0 %v3781_v30, %s3860_s15  ;;  %v2088_v30 = vld [vmem:[%s4646_s2 + $0x110] sm:$0xff] }
0x2083   :  { %v1695_v33 = vpop.permute.xlu0 %1694 }
0x2084   :  { %v1697_v36 = vmul.f32 %v1695_v33, %v1692_v32  ;;  %v2089_v32 = vld [vmem:[%s4646_s2 + $0x120] sm:$0xff] }
0x2085   :  { %v3656_v33 = vpack.c.bf16 %v2089_v32, %v2088_v30 }
0x2086   :  { %v4341_v37 = vadd.f32 %v1698_v34, %v1697_v36  ;;  %v2090_v34 = vld [vmem:[%s4646_s2 + $0x130] sm:$0xff]  ;;  %v2091_v36 = vld [vmem:[%s4646_s2 + $0x140] sm:$0xff] }
0x2087   :  { %3657 = vmatprep.subr.bf16.mxu1 %v3656_v33 }
0x2088   :  { %v1701_v38 = vsel %vm310_vm3, %v1592_v19, %v4341_v37 }
0x2089   :  { %3078 = vmatmul.mubr.msk.f32.vlgmr.msra.gmra.mrb[14].mxu1 %vm201_vm4, %v1701_v38 }
0x208a   :  { %3659 = vmatpush3.bf16.msra.mxu1 %v3656_v33 }
0x215c   :  { %v1771_v39 = vpop.f32.mrb[14].mxu1 }
0x215d   :  { %v1783_v40 = vadd.f32 %v1771_v39, %v3995_v31  ;;  %v1773_v41 = vpop.f32.mrb[15].mxu1  ;;  %v1776_v45 = vadd.f32 %v1771_v39, %v198_v43 }
0x215e   :  { %v1893_v12 = vadd.f32 %v1773_v41, %v4064_v2 }
0x215f   :  { %1785 = vrot.lane.b32.xlu1 %v1783_v40, %s3859_s28  ;;  %v3079_v47 = vmul.f32 -1.442695, %v1776_v45 }
0x2161   :  { %3782 = vpow2.f32 %v3079_v47 }
0x216b   :  { %v3783_v49 = vpop.eup %3782 }
0x216c   :  { %v1780_v53 = vadd.f32 1.0, %v3783_v49 }
0x216e   :  { %3784 = vrcp.f32 %v1780_v53 }
0x2178   :  { %v3785_v56 = vpop.eup %3784 }
0x2179   :  { %v1795_v62 = vsub.f32 1.0, %v3785_v56  ;;  %v1801_v52 = vmul.f32 %v3785_v56, %v4322_v15 }
0x21d1   :  { %v1786_v58 = vpop.permute.xlu1 %1785 }
0x21d2   :  { %v1788_v59 = vmul.f32 %v3785_v56, %v1786_v58 }
0x21d4   :  { %1790 = vrot.lane.b32.xlu0 %v1788_v59, %s3859_s28 }
0x2246   :  { %v1791_v31 = vpop.permute.xlu0 %1790 }
0x2247   :  { %v1793_v60 = vadd.f32 %v1791_v31, %v198_v43 }
0x2249   :  { %3786 = vtanh.f32 %v1793_v60 }
0x2253   :  { %v3787_v61 = vpop.eup %3786 }
0x2254   :  { %1797 = vrot.lane.b32.xlu1 %v3787_v61, %s3860_s15 }
0x2258   :  { %1880 = vrot.lane.b32.xlu1 %v1771_v39, %s3862_s25  ;;  %v1917_v39 = vld [vmem:[%s4646_s2 + $0x260] ss:$0 sm:$0xff] }
0x225c   :  { %1895 = vrot.lane.b32.xlu1 %v1893_v12, %s3860_s15 }
0x22c6   :  { %v1798_v29 = vpop.permute.xlu1 %1797 }
0x22c7   :  { %v1800_v63 = vmul.f32 %v1798_v29, %v1795_v62 }
0x22c9   :  { %v4358_v6 = vadd.f32 %v1801_v52, %v1800_v63 }
0x22ca   :  { %v1881_v2 = vpop.permute.xlu1 %1880 }
0x22cb   :  { %1804 = vrot.lane.b32.xlu0 %v4358_v6, %s3860_s15 }
0x22ce   :  { %v1896_v19 = vpop.permute.xlu1 %1895 }
0x22cf   :  { %1882 = vrot.lane.b32.xlu0 %v1773_v41, %s3862_s25  ;;  %v2071_v41 = vstv %s30_s24 }
0x233d   :  { %v1805_v0 = vpop.permute.xlu0 %1804 }
0x233e   :  { %3356 = vmatmul.mubr.msk.f32.vlgmr.msra.gmra.mrb[22].mxu0 %vm310_vm3, %v1805_v0 }
0x2341   :  { %v1883_v51 = vpop.permute.xlu0 %1882 }
0x2342   :  { %v1884_v35 = vsel %vm310_vm3, %v1881_v2, %v1883_v51 }
0x2411   :  { %v1874_v57 = vpop.f32.mrb[22].mxu0 }
0x2412   :  { %v1875_v5 = vadd.f32 %v1874_v57, %v4091_v16  ;;  %v3357_v3 = vpop.f32.mrb[23].mxu0  ;;  %v1913_v16 = vld [vmem:[%s4646_s2 + $0xd0] sm:$0xff] }
0x2413   :  { %v3648_v22 = vpack.c.bf16 %v1914_v21, %v1913_v16 }
0x2414   :  { %v1886_v13 = vadd.f32 %v1884_v35, %v1875_v5  ;;  %v2247_v35 = vld [vmem:[%s4646_s2 + $0x150] sm:$0xff] }
0x2415   :  { %3649 = vmatprep.subr.bf16.mxu0 %v3648_v22 }
0x2416   :  { %v3081_v4 = vmul.f32 -1.442695, %v1886_v13  ;;  %3651 = vmatpush3.bf16.msra.mxu0 %v3648_v22  ;;  %v2248_v13 = vld [vmem:[%s4646_s2 + $0x160] sm:$0xff] }
0x2418   :  { %3788 = vpow2.f32 %v3081_v4  ;;  %v3664_v4 = vpack.c.bf16 %v2248_v13, %v2247_v35 }
0x2422   :  { %v3789_v11 = vpop.eup %3788 }
0x2423   :  { %v1890_v10 = vadd.f32 1.0, %v3789_v11  ;;  %v2249_v11 = vld [vmem:[%s4646_s2 + $0x170] sm:$0xff] }
0x2425   :  { %3790 = vrcp.f32 %v1890_v10  ;;  %v2250_v10 = vld [vmem:[%s4646_s2 + $0x180] sm:$0xff] }
0x242f   :  { %v3791_v15 = vpop.eup %3790 }
0x2430   :  { %v1898_v20 = vmul.f32 %v3791_v15, %v1896_v19  ;;  %v1905_v9 = vsub.f32 1.0, %v3791_v15  ;;  %v1911_v17 = vmul.f32 %v3791_v15, %v4341_v37  ;;  %v3668_v15 = vpack.c.bf16 %v2250_v10, %v2249_v11  ;;  %v2461_v11 = vld [vmem:[%s4646_s2 + $0x190] sm:$0xff] }
0x2432   :  { %1900 = vrot.lane.b32.xlu0 %v1898_v20, %s3859_s28 }
0x2436   :  { %1926 = vrot.lane.b32.xlu0 %v4097_v44, %s3860_s15  ;;  %v1915_v44 = vld [vmem:[%s4646_s2 + $0xf0] sm:$0xff] }
0x243a   :  { %1930 = vrot.lane.b32.xlu0 %v4179_v48, %s3860_s15  ;;  %v1916_v48 = vld [vmem:[%s4646_s2 + $0x100] sm:$0xff] }
0x243e   :  { %1934 = vrot.lane.b32.xlu0 %v4261_v54, %s3860_s15  ;;  %v3652_v54 = vpack.c.bf16 %v1916_v48, %v1915_v44 }
0x2440   :  { %3653 = vmatprep.subr.bf16.mxu0 %v3652_v54 }
0x2441   :  { %3655 = vmatpush3.bf16.msra.mxu0 %v3652_v54 }
0x2442   :  { %1938 = vrot.lane.b32.xlu0 %v4341_v37, %s3860_s15  ;;  %v3660_v37 = vpack.c.bf16 %v2091_v36, %v2090_v34  ;;  %3665 = vmatprep.subr.bf16.mxu0 %v3664_v4 }
0x2444   :  { %3661 = vmatprep.subr.bf16.mxu1 %v3660_v37 }
0x2445   :  { %3663 = vmatpush3.bf16.msra.mxu1 %v3660_v37 }
0x2446   :  { %3418 = vmatprep.subr.mxu1 %v2461_v11 }
0x24a4   :  { %v1901_v18 = vpop.permute.xlu0 %1900 }
0x24a5   :  { %v1903_v8 = vadd.f32 %v1901_v18, %v1875_v5  ;;  %v2092_v18 = vld [vmem:[%s4646_s2 + $0x270] ss:$0 sm:$0xff] }
0x24a7   :  { %3792 = vtanh.f32 %v1903_v8 }
0x24a8   :  { %v1927_v1 = vpop.permute.xlu0 %1926 }
0x24a9   :  { %3366 = vmatprep.mubr.msk.f32.mxu0 %vm310_vm3, %v1927_v1  ;;  %v2230_v1 = vstv %s3039_s9 }
0x24ac   :  { %v1931_v26 = vpop.permute.xlu0 %1930 }
0x24b1   :  { %v3793_v23 = vpop.eup %3792 }
0x24b2   :  { %1907 = vrot.lane.b32.xlu1 %v3793_v23, %s3860_s15 }
0x24b6   :  { %1928 = vrot.lane.b32.xlu1 %v4138_v46, %s3860_s15  ;;  %v1935_v46 = vpop.permute.xlu0 %1934 }
0x24ba   :  { %1932 = vrot.lane.b32.xlu1 %v4220_v50, %s3860_s15  ;;  %v1939_v28 = vpop.permute.xlu0 %1938 }
0x24be   :  { %1936 = vrot.lane.b32.xlu1 %v4302_v55, %s3860_s15 }
0x2524   :  { %v1908_v14 = vpop.permute.xlu1 %1907 }
0x2525   :  { %v1910_v24 = vmul.f32 %v1908_v14, %v1905_v9 }
0x2527   :  { %v4396_v27 = vadd.f32 %v1911_v17, %v1910_v24 }
0x2528   :  { %v1929_v25 = vpop.permute.xlu1 %1928 }
0x2529   :  { %1940 = vrot.lane.b32.xlu1 %v4396_v27, %s3860_s15  ;;  %3367 = vmatmul.mubr.msk.f32.vlgmr.msra.gmra.mrb[24].mxu0 %vm310_vm3, %v1929_v25 }
0x252a   :  { %3369 = vmatprep.mubr.msk.f32.mxu0 %vm310_vm3, %v1931_v26  ;;  %3667 = vmatpush3.bf16.msra.mxu0 %v3664_v4 }
0x252b   :  { %3669 = vmatprep.subr.bf16.mxu0 %v3668_v15 }
0x252c   :  { %v1933_v50 = vpop.permute.xlu1 %1932 }
0x252d   :  { %3370 = vmatmul.mubr.msk.f32.gmra.mrb[26].mxu0 %vm310_vm3, %v1933_v50 }
0x252e   :  { %3372 = vmatprep.mubr.msk.f32.mxu0 %vm310_vm3, %v1935_v46  ;;  %3671 = vmatpush3.bf16.msra.mxu0 %v3668_v15 }
0x2530   :  { %v1937_v55 = vpop.permute.xlu1 %1936 }
0x2531   :  { %3373 = vmatmul.mubr.msk.f32.gmra.mrb[28].mxu0 %vm310_vm3, %v1937_v55 }
0x2532   :  { %3375 = vmatprep.mubr.msk.f32.mxu0 %vm310_vm3, %v1939_v28 }
0x259b   :  { %v1941_v38 = vpop.permute.xlu1 %1940 }
0x259c   :  { %3376 = vmatmul.mubr.msk.f32.gmra.mrb[30].mxu0 %vm310_vm3, %v1941_v38 }
0x25fc   :  { %v3368_v40 = vpop.f32.mrb[24].mxu0 }
0x25fd   :  { %v2030_v42 = vadd.f32 %v3368_v40, %v1917_v39  ;;  %v2024_v43 = vpop.f32.mrb[25].mxu0 }
0x25fe   :  { %v2025_v45 = vadd.f32 %v2024_v43, %v1917_v39 }
0x25ff   :  { %v2073_v47 = vmul.f32 %v2071_v41, %v2030_v42  ;;  %vm2064_vm5 = vcmp.ge.f32.partialorder %v2030_v42, 0.0 }
0x2600   :  { %vm2063_vm6 = vcmp.ge.f32.partialorder %v2025_v45, 0.0  ;;  %v2072_v49 = vmul.f32 %v2071_v41, %v2025_v45  ;;  %v3371_v53 = vpop.f32.mrb[26].mxu0 }
0x2601   :  { %v2040_v56 = vadd.f32 %v3371_v53, %v1917_v39  ;;  %v2034_v58 = vpop.f32.mrb[27].mxu0  ;;  %v2081_v60 = vsel %vm2064_vm5, %v2030_v42, %v2073_v47 }
0x2602   :  { %v2035_v59 = vadd.f32 %v2034_v58, %v1917_v39  ;;  %v2080_v31 = vsel %vm2063_vm6, %v2025_v45, %v2072_v49 }
0x2603   :  { %v2075_v61 = vmul.f32 %v2071_v41, %v2040_v56  ;;  %3386 = vmatprep.mubr.msk.f32.mxu1 %vm310_vm3, %v2080_v31  ;;  %vm2066_vm7 = vcmp.ge.f32.partialorder %v2040_v56, 0.0 }
0x2604   :  { %vm2065_vm8 = vcmp.ge.f32.partialorder %v2035_v59, 0.0  ;;  %v2074_v12 = vmul.f32 %v2071_v41, %v2035_v59  ;;  %v3374_v62 = vpop.f32.mrb[28].mxu0  ;;  %3387 = vmatmul.mubr.msk.f32.vlgmr.msra.gmra.mrb[16].mxu1 %vm310_vm3, %v2081_v60  ;;  %v2251_v60 = vld [vmem:[%s4646_s2 + $0x280] ss:$0 sm:$0xff] }
0x2605   :  { %v2050_v29 = vadd.f32 %v3374_v62, %v1917_v39  ;;  %v2044_v52 = vpop.f32.mrb[29].mxu0  ;;  %v2083_v57 = vsel %vm2066_vm7, %v2040_v56, %v2075_v61  ;;  %3419 = vmatpush3.msra.mxu1 %v2461_v11  ;;  %vm2463_vm7 = vcmask 64512   ;;  %v2462_v11 = vld [vmem:[%s4646_s2 + $0x290] ss:$0 sm:$0xff] }
0x2606   :  { %v2045_v63 = vadd.f32 %v2044_v52, %v1917_v39  ;;  %v2082_v0 = vsel %vm2065_vm8, %v2035_v59, %v2074_v12 }
0x2607   :  { %v2077_v51 = vmul.f32 %v2071_v41, %v2050_v29  ;;  %3389 = vmatprep.mubr.msk.f32.mxu1 %vm310_vm3, %v2082_v0  ;;  %vm2068_vm9 = vcmp.ge.f32.partialorder %v2050_v29, 0.0 }
0x2608   :  { %vm2067_vm10 = vcmp.ge.f32.partialorder %v2045_v63, 0.0  ;;  %v2076_v2 = vmul.f32 %v2071_v41, %v2045_v63  ;;  %3390 = vmatmul.mubr.msk.f32.gmra.mrb[18].mxu1 %vm310_vm3, %v2083_v57 }
0x2609   :  { %v2085_v3 = vsel %vm2068_vm9, %v2050_v29, %v2077_v51 }
0x260a   :  { %v2084_v5 = vsel %vm2067_vm10, %v2045_v63, %v2076_v2 }
0x260b   :  { %3392 = vmatprep.mubr.msk.f32.mxu1 %vm310_vm3, %v2084_v5 }
0x260c   :  { %3393 = vmatmul.mubr.msk.f32.gmra.mrb[20].mxu1 %vm310_vm3, %v2085_v3 }
0x266f   :  { %v3377_v19 = vpop.f32.mrb[30].mxu0 }
0x2670   :  { %v2060_v20 = vadd.f32 %v3377_v19, %v1917_v39  ;;  %v2054_v16 = vpop.f32.mrb[31].mxu0 }
0x2671   :  { %v2055_v21 = vadd.f32 %v2054_v16, %v1917_v39 }
0x2672   :  { %v2079_v22 = vmul.f32 %v2071_v41, %v2060_v20  ;;  %vm2070_vm11 = vcmp.ge.f32.partialorder %v2060_v20, 0.0 }
0x2673   :  { %vm2069_vm12 = vcmp.ge.f32.partialorder %v2055_v21, 0.0  ;;  %v2078_v44 = vmul.f32 %v2071_v41, %v2055_v21 }
0x2674   :  { %v2087_v54 = vsel %vm2070_vm11, %v2060_v20, %v2079_v22 }
0x2675   :  { %v2086_v48 = vsel %vm2069_vm12, %v2055_v21, %v2078_v44 }
0x2676   :  { %3395 = vmatprep.mubr.msk.f32.mxu1 %vm310_vm3, %v2086_v48 }
0x2677   :  { %3396 = vmatmul.mubr.msk.f32.gmra.mrb[22].mxu1 %vm310_vm3, %v2087_v54 }
0x26d7   :  { %v3388_v8 = vpop.f32.mrb[16].mxu1 }
0x26d8   :  { %v2189_v23 = vadd.f32 %v3388_v8, %v2092_v18  ;;  %v2183_v9 = vpop.f32.mrb[17].mxu1 }
0x26d9   :  { %v2184_v14 = vadd.f32 %v2183_v9, %v2092_v18 }
0x26da   :  { %v2232_v26 = vmul.f32 %v2230_v1, %v2189_v23  ;;  %vm2223_vm13 = vcmp.ge.f32.partialorder %v2189_v23, 0.0 }
0x26db   :  { %vm2222_vm14 = vcmp.ge.f32.partialorder %v2184_v14, 0.0  ;;  %v2231_v17 = vmul.f32 %v2230_v1, %v2184_v14  ;;  %v3391_v24 = vpop.f32.mrb[18].mxu1 }
0x26dc   :  { %v2199_v25 = vadd.f32 %v3391_v24, %v2092_v18  ;;  %v2193_v46 = vpop.f32.mrb[19].mxu1  ;;  %v2240_v28 = vsel %vm2223_vm13, %v2189_v23, %v2232_v26 }
0x26dd   :  { %v2194_v50 = vadd.f32 %v2193_v46, %v2092_v18  ;;  %v2239_v55 = vsel %vm2222_vm14, %v2184_v14, %v2231_v17 }
0x26de   :  { %v2234_v30 = vmul.f32 %v2230_v1, %v2199_v25  ;;  %3406 = vmatprep.mubr.msk.f32.mxu0 %vm310_vm3, %v2239_v55  ;;  %vm2225_vm15 = vcmp.ge.f32.partialorder %v2199_v25, 0.0 }
0x26df   :  { %vm2224_vm0 = vcmp.ge.f32.partialorder %v2194_v50, 0.0  ;;  %v2233_v32 = vmul.f32 %v2230_v1, %v2194_v50  ;;  %v3394_v33 = vpop.f32.mrb[20].mxu1  ;;  %3407 = vmatmul.mubr.msk.f32.vlgmr.msra.gmra.mrb[32].mxu0 %vm310_vm3, %v2240_v28  ;;  %v2382_v28 = vld [vmem:[%s4645_s1 + $0x8] sm:$0xff] }
0x26e0   :  { %v2209_v34 = vadd.f32 %v3394_v33, %v2092_v18  ;;  %v2203_v36 = vpop.f32.mrb[21].mxu1  ;;  %v2242_v40 = vsel %vm2225_vm15, %v2199_v25, %v2234_v30  ;;  %v2381_v30 = vld [vmem:[%s4645_s1] sm:$0xff] }
0x26e1   :  { %v2204_v37 = vadd.f32 %v2203_v36, %v2092_v18  ;;  %v2241_v38 = vsel %vm2224_vm0, %v2194_v50, %v2233_v32 }
0x26e2   :  { %v2236_v39 = vmul.f32 %v2230_v1, %v2209_v34  ;;  %3409 = vmatprep.mubr.msk.f32.mxu0 %vm310_vm3, %v2241_v38  ;;  %vm2227_vm2 = vcmp.ge.f32.partialorder %v2209_v34, 0.0 }
0x26e3   :  { %vm2226_vm4 = vcmp.ge.f32.partialorder %v2204_v37, 0.0  ;;  %v2235_v41 = vmul.f32 %v2230_v1, %v2204_v37  ;;  %3410 = vmatmul.mubr.msk.f32.gmra.mrb[34].mxu0 %vm310_vm3, %v2242_v40  ;;  %v2383_v40 = vld [vmem:[%s4645_s1 + $0x10] sm:$0xff] }
0x26e4   :  { %v2244_v43 = vsel %vm2227_vm2, %v2209_v34, %v2236_v39  ;;  %v2384_v39 = vld [vmem:[%s4645_s1 + $0x18] sm:$0xff] }
0x26e5   :  { %v2243_v42 = vsel %vm2226_vm4, %v2204_v37, %v2235_v41 }
0x26e6   :  { %3412 = vmatprep.mubr.msk.f32.mxu0 %vm310_vm3, %v2243_v42 }
0x26e7   :  { %3413 = vmatmul.mubr.msk.f32.gmra.mrb[36].mxu0 %vm310_vm3, %v2244_v43 }
0x274a   :  { %v3397_v45 = vpop.f32.mrb[22].mxu1 }
0x274b   :  { %v2219_v47 = vadd.f32 %v3397_v45, %v2092_v18  ;;  %v2213_v49 = vpop.f32.mrb[23].mxu1 }
0x274c   :  { %v2214_v53 = vadd.f32 %v2213_v49, %v2092_v18 }
0x274d   :  { %v2238_v56 = vmul.f32 %v2230_v1, %v2219_v47  ;;  %vm2229_vm5 = vcmp.ge.f32.partialorder %v2219_v47, 0.0 }
0x274e   :  { %vm2228_vm6 = vcmp.ge.f32.partialorder %v2214_v53, 0.0  ;;  %v2237_v58 = vmul.f32 %v2230_v1, %v2214_v53 }
0x274f   :  { %v2246_v31 = vsel %vm2229_vm5, %v2219_v47, %v2238_v56  ;;  %v2385_v56 = vld [vmem:[%s4645_s1 + $0x20] sm:$0xff] }
0x2750   :  { %v2245_v59 = vsel %vm2228_vm6, %v2214_v53, %v2237_v58  ;;  %v2386_v53 = vld [vmem:[%s4645_s1 + $0x28] sm:$0xff] }
0x2751   :  { %3415 = vmatprep.mubr.msk.f32.mxu0 %vm310_vm3, %v2245_v59 }
0x2752   :  { %3416 = vmatmul.mubr.msk.f32.gmra.mrb[38].mxu0 %vm310_vm3, %v2246_v31 }
0x27b2   :  { %v3408_v61 = vpop.f32.mrb[32].mxu0 }
0x27b3   :  { %v4456_v12 = vadd.f32 %v3408_v61, %v2251_v60  ;;  %v2342_v62 = vpop.f32.mrb[33].mxu0 }
0x27b4   :  { %v4458_v29 = vadd.f32 %v2342_v62, %v2251_v60 }
0x27b5   :  { %v2390_v52 = vmul.f32 0.5, %v4456_v12 }
0x27b6   :  { %v2389_v63 = vmul.f32 0.5, %v4458_v29  ;;  %v3411_v0 = vpop.f32.mrb[34].mxu0 }
0x27b7   :  { %v2399_v51 = vmul.f32 1.442695, %v2390_v52  ;;  %v4462_v57 = vadd.f32 %v3411_v0, %v2251_v60  ;;  %v2352_v2 = vpop.f32.mrb[35].mxu0  ;;  %v2618_v52 = vld [vmem:[%s4646_s2 + $0x1a0] sm:$0xff] }
0x27b8   :  { %v2397_v5 = vmul.f32 1.442695, %v2389_v63  ;;  %v4464_v3 = vadd.f32 %v2352_v2, %v2251_v60  ;;  %v2619_v63 = vld [vmem:[%s4646_s2 + $0x1b0] sm:$0xff] }
0x27b9   :  { %3794 = vpow2.f32 %v2399_v51  ;;  %v2392_v35 = vmul.f32 0.5, %v4462_v57  ;;  %v3672_v0 = vpack.c.bf16 %v2619_v63, %v2618_v52  ;;  %v2620_v51 = vld [vmem:[%s4646_s2 + $0x1c0] sm:$0xff] }
0x27ba   :  { %3796 = vpow2.f32 %v2397_v5  ;;  %v2391_v13 = vmul.f32 0.5, %v4464_v3  ;;  %v3414_v4 = vpop.f32.mrb[36].mxu0 }
0x27bb   :  { %v2403_v10 = vmul.f32 1.442695, %v2392_v35  ;;  %v4471_v15 = vadd.f32 %v3414_v4, %v2251_v60  ;;  %v2362_v19 = vpop.f32.mrb[37].mxu0  ;;  %3673 = vmatprep.subr.bf16.mxu0 %v3672_v0 }
0x27bc   :  { %v2401_v20 = vmul.f32 1.442695, %v2391_v13  ;;  %v4473_v16 = vadd.f32 %v2362_v19, %v2251_v60  ;;  %3675 = vmatpush3.bf16.msra.mxu0 %v3672_v0 }
0x27bd   :  { %3798 = vpow2.f32 %v2403_v10  ;;  %v2394_v21 = vmul.f32 0.5, %v4471_v15 }
0x27be   :  { %3800 = vpow2.f32 %v2401_v20  ;;  %v2393_v22 = vmul.f32 0.5, %v4473_v16 }
0x27bf   :  { %v2407_v44 = vmul.f32 1.442695, %v2394_v21 }
0x27c0   :  { %v2405_v48 = vmul.f32 1.442695, %v2393_v22 }
0x27c1   :  { %3802 = vpow2.f32 %v2407_v44 }
0x27c2   :  { %3804 = vpow2.f32 %v2405_v48 }
0x27c3   :  { %v3795_v54 = vpop.eup %3794 }
0x27c4   :  { %v3797_v18 = vpop.eup %3796  ;;  %2423 = vrot.lane.b32.xlu1 %v3795_v54, %s3864_s16 }
0x27c5   :  { %2421 = vrot.lane.b32.xlu0 %v3797_v18, %s3864_s16 }
0x27c7   :  { %v3799_v8 = vpop.eup %3798 }
0x27c8   :  { %v3801_v1 = vpop.eup %3800  ;;  %2427 = vrot.lane.b32.xlu1 %v3799_v8, %s3864_s16 }
0x27c9   :  { %2425 = vrot.lane.b32.xlu0 %v3801_v1, %s3864_s16 }
0x27cb   :  { %v3803_v23 = vpop.eup %3802 }
0x27cc   :  { %v3805_v9 = vpop.eup %3804  ;;  %2431 = vrot.lane.b32.xlu1 %v3803_v23, %s3864_s16 }
0x27cd   :  { %2429 = vrot.lane.b32.xlu0 %v3805_v9, %s3864_s16 }
0x2825   :  { %v3417_v14 = vpop.f32.mrb[38].mxu0 }
0x2826   :  { %v4477_v26 = vadd.f32 %v3417_v14, %v2251_v60  ;;  %v2372_v17 = vpop.f32.mrb[39].mxu0 }
0x2827   :  { %v4479_v24 = vadd.f32 %v2372_v17, %v2251_v60 }
0x2828   :  { %v2396_v25 = vmul.f32 0.5, %v4477_v26 }
0x2829   :  { %v2395_v46 = vmul.f32 0.5, %v4479_v24 }
0x282a   :  { %v2411_v50 = vmul.f32 1.442695, %v2396_v25 }
0x282b   :  { %v2409_v55 = vmul.f32 1.442695, %v2395_v46 }
0x282c   :  { %3806 = vpow2.f32 %v2411_v50 }
0x282d   :  { %3808 = vpow2.f32 %v2409_v55 }
0x2836   :  { %v3807_v32 = vpop.eup %3806  ;;  %v2424_v33 = vpop.permute.xlu1 %2423 }
0x2837   :  { %v3809_v34 = vpop.eup %3808  ;;  %v2446_v36 = vmul.f32 %v2424_v33, %v2382_v28  ;;  %2435 = vrot.lane.b32.xlu1 %v3807_v32, %s3864_s16  ;;  %v2422_v37 = vpop.permute.xlu0 %2421  ;;  %v2777_v32 = vld [vmem:[%s4646_s2 + $0x1e0] sm:$0xff]  ;;  %v2778_v33 = vld [vmem:[%s4646_s2 + $0x1f0] sm:$0xff] }
0x2838   :  { %v2445_v38 = vmul.f32 %v2422_v37, %v2381_v30  ;;  %2433 = vrot.lane.b32.xlu0 %v3809_v34, %s3864_s16  ;;  %v3680_v34 = vpack.c.bf16 %v2778_v33, %v2777_v32  ;;  %v2780_v37 = vld [vmem:[%s4646_s2 + $0x210] sm:$0xff] }
0x2839   :  { %v2454_v43 = vadd.f32 %v2446_v36, %v4456_v12  ;;  %v2779_v36 = vld [vmem:[%s4646_s2 + $0x200] sm:$0xff] }
0x283a   :  { %v2453_v41 = vadd.f32 %v2445_v38, %v4458_v29  ;;  %v2428_v42 = vpop.permute.xlu1 %2427  ;;  %3681 = vmatprep.subr.bf16.mxu1 %v3680_v34  ;;  %v3684_v38 = vpack.c.bf16 %v2780_v37, %v2779_v36 }
0x283b   :  { %v2448_v45 = vmul.f32 %v2428_v42, %v2384_v39  ;;  %2969 = vrot.lane.b32.xlu1 %v4456_v12, %s3865_s3  ;;  %v2426_v47 = vpop.permute.xlu0 %2425 }
0x283c   :  { %v2447_v49 = vmul.f32 %v2426_v47, %v2383_v40  ;;  %2967 = vrot.lane.b32.xlu0 %v4458_v29, %s3865_s3  ;;  %3420 = vmatprep.mubr.msk.f32.mxu1 %vm2463_vm7, %v2453_v41 }
0x283d   :  { %3421 = vmatmul.mubr.msk.f32.vlgmr.msra.gmra.mrb[24].mxu1 %vm2463_vm7, %v2454_v43  ;;  %v2456_v31 = vadd.f32 %v2448_v45, %v4462_v57 }
0x283e   :  { %v2455_v58 = vadd.f32 %v2447_v49, %v4464_v3  ;;  %v2432_v59 = vpop.permute.xlu1 %2431  ;;  %3683 = vmatpush3.bf16.msra.mxu1 %v3680_v34 }
0x283f   :  { %v2450_v60 = vmul.f32 %v2432_v59, %v2386_v53  ;;  %2973 = vrot.lane.b32.xlu1 %v4462_v57, %s3865_s3  ;;  %v2430_v61 = vpop.permute.xlu0 %2429  ;;  %v2387_v57 = vld [vmem:[%s4645_s1 + $0x30] sm:$0xff]  ;;  %3685 = vmatprep.subr.bf16.mxu1 %v3684_v38  ;;  %v2622_v53 = vld [vmem:[%s4646_s2 + $0x2a0] ss:$0 sm:$0xff] }
0x2840   :  { %v2449_v12 = vmul.f32 %v2430_v61, %v2385_v56  ;;  %2971 = vrot.lane.b32.xlu0 %v4464_v3, %s3865_s3  ;;  %3423 = vmatprep.mubr.msk.f32.mxu1 %vm2463_vm7, %v2455_v58 }
0x2841   :  { %3424 = vmatmul.mubr.msk.f32.gmra.mrb[26].mxu1 %vm2463_vm7, %v2456_v31  ;;  %v2458_v29 = vadd.f32 %v2450_v60, %v4471_v15 }
0x2842   :  { %v2457_v62 = vadd.f32 %v2449_v12, %v4473_v16  ;;  %3687 = vmatpush3.bf16.msra.mxu1 %v3684_v38 }
0x2843   :  { %2977 = vrot.lane.b32.xlu1 %v4471_v15, %s3865_s3  ;;  %v2601_v15 = vstv %s3040_s14 }
0x2844   :  { %2975 = vrot.lane.b32.xlu0 %v4473_v16, %s3865_s3  ;;  %3426 = vmatprep.mubr.msk.f32.mxu1 %vm2463_vm7, %v2457_v62 }
0x2845   :  { %3427 = vmatmul.mubr.msk.f32.gmra.mrb[28].mxu1 %vm2463_vm7, %v2458_v29 }
0x2847   :  { %2981 = vrot.lane.b32.xlu1 %v4477_v26, %s3865_s3 }
0x2848   :  { %2979 = vrot.lane.b32.xlu0 %v4479_v24, %s3865_s3  ;;  %s3041_s3 = sld [smem:[#allocation2 + $0x3]] }
0x284b   :  { %2993 = vrot.lane.b32.xlu1 %v4396_v27, %s3866_s29  ;;  %v2388_v27 = vld [vmem:[%s4645_s1 + $0x38] sm:$0xff] }
0x284c   :  { %2991 = vrot.lane.b32.xlu0 %v4358_v6, %s3866_s29  ;;  %v2621_v6 = vld [vmem:[%s4646_s2 + $0x1d0] sm:$0xff] }
0x284e   :  { %v2760_v58 = vstv %s3041_s3 }
0x2850   :  { %2995 = vrot.lane.b32.xlu0 %v3858_v7, %s3866_s29  ;;  %v3676_v7 = vpack.c.bf16 %v2621_v6, %v2620_v51 }
0x2852   :  { %3677 = vmatprep.subr.bf16.mxu0 %v3676_v7 }
0x2853   :  { %3679 = vmatpush3.bf16.msra.mxu0 %v3676_v7 }
0x28a9   :  { %v2436_v2 = vpop.permute.xlu1 %2435 }
0x28aa   :  { %v2452_v5 = vmul.f32 %v2436_v2, %v2388_v27  ;;  %v2434_v3 = vpop.permute.xlu0 %2433 }
0x28ab   :  { %v2451_v35 = vmul.f32 %v2434_v3, %v2387_v57 }
0x28ac   :  { %v2460_v4 = vadd.f32 %v2452_v5, %v4477_v26 }
0x28ad   :  { %v2459_v13 = vadd.f32 %v2451_v35, %v4479_v24 }
0x28af   :  { %3429 = vmatprep.mubr.msk.f32.mxu1 %vm2463_vm7, %v2459_v13 }
0x28b0   :  { %3430 = vmatmul.mubr.msk.f32.gmra.mrb[30].mxu1 %vm2463_vm7, %v2460_v4 }
0x2910   :  { %v3422_v10 = vpop.f32.mrb[24].mxu1 }
0x2911   :  { %v2560_v19 = vadd.f32 %v3422_v10, %v2462_v11  ;;  %v2554_v20 = vpop.f32.mrb[25].mxu1 }
0x2912   :  { %v2555_v16 = vadd.f32 %v2554_v20, %v2462_v11 }
0x2913   :  { %v2603_v21 = vmul.f32 %v2601_v15, %v2560_v19  ;;  %vm2594_vm8 = vcmp.ge.f32.partialorder %v2560_v19, 0.0 }
0x2914   :  { %vm2593_vm9 = vcmp.ge.f32.partialorder %v2555_v16, 0.0  ;;  %v2602_v22 = vmul.f32 %v2601_v15, %v2555_v16  ;;  %v3425_v44 = vpop.f32.mrb[26].mxu1 }
0x2915   :  { %v2570_v48 = vadd.f32 %v3425_v44, %v2462_v11  ;;  %v2564_v54 = vpop.f32.mrb[27].mxu1  ;;  %v2611_v1 = vsel %vm2594_vm8, %v2560_v19, %v2603_v21 }
0x2916   :  { %v2565_v18 = vadd.f32 %v2564_v54, %v2462_v11  ;;  %v2610_v8 = vsel %vm2593_vm9, %v2555_v16, %v2602_v22  ;;  %v4583_v54 = vld [vmem:[%s4646_s2 + $0x2b0] ss:$0 sm:$0xff] }
0x2917   :  { %v2605_v23 = vmul.f32 %v2601_v15, %v2570_v48  ;;  %3440 = vmatprep.mubr.msk.f32.mxu0 %vm310_vm3, %v2610_v8  ;;  %vm2596_vm10 = vcmp.ge.f32.partialorder %v2570_v48, 0.0 }
0x2918   :  { %vm2595_vm11 = vcmp.ge.f32.partialorder %v2565_v18, 0.0  ;;  %v2604_v9 = vmul.f32 %v2601_v15, %v2565_v18  ;;  %v3428_v14 = vpop.f32.mrb[28].mxu1  ;;  %3441 = vmatmul.mubr.msk.f32.vlgmr.msra.gmra.mrb[40].mxu0 %vm310_vm3, %v2611_v1 }
0x2919   :  { %v2580_v26 = vadd.f32 %v3428_v14, %v2462_v11  ;;  %v2574_v17 = vpop.f32.mrb[29].mxu1  ;;  %v2613_v50 = vsel %vm2596_vm10, %v2570_v48, %v2605_v23  ;;  %vm3017_vm10 = vcmask 424960  }
0x291a   :  { %v2575_v24 = vadd.f32 %v2574_v17, %v2462_v11  ;;  %v2612_v25 = vsel %vm2595_vm11, %v2565_v18, %v2604_v9  ;;  %v2968_v9 = vpop.permute.xlu0 %2967 }
0x291b   :  { %v2607_v46 = vmul.f32 %v2601_v15, %v2580_v26  ;;  %3443 = vmatprep.mubr.msk.f32.mxu0 %vm310_vm3, %v2612_v25  ;;  %vm2598_vm12 = vcmp.ge.f32.partialorder %v2580_v26, 0.0 }
0x291c   :  { %vm2597_vm13 = vcmp.ge.f32.partialorder %v2575_v24, 0.0  ;;  %v2606_v55 = vmul.f32 %v2601_v15, %v2575_v24  ;;  %3444 = vmatmul.mubr.msk.f32.gmra.mrb[42].mxu0 %vm310_vm3, %v2613_v50 }
0x291d   :  { %v2615_v30 = vsel %vm2598_vm12, %v2580_v26, %v2607_v46 }
0x291e   :  { %v2614_v28 = vsel %vm2597_vm13, %v2575_v24, %v2606_v55  ;;  %v2970_v24 = vpop.permute.xlu1 %2969  ;;  %v2972_v32 = vpop.permute.xlu0 %2971 }
0x291f   :  { %3446 = vmatprep.mubr.msk.f32.mxu0 %vm310_vm3, %v2614_v28 }
0x2920   :  { %3447 = vmatmul.mubr.msk.f32.gmra.mrb[44].mxu0 %vm310_vm3, %v2615_v30 }
0x2922   :  { %v2974_v37 = vpop.permute.xlu1 %2973 }
0x2983   :  { %v3431_v39 = vpop.f32.mrb[30].mxu1 }
0x2984   :  { %v2590_v40 = vadd.f32 %v3431_v39, %v2462_v11  ;;  %v2584_v41 = vpop.f32.mrb[31].mxu1 }
0x2985   :  { %v2585_v42 = vadd.f32 %v2584_v41, %v2462_v11  ;;  %v2976_v41 = vpop.permute.xlu0 %2975 }
0x2986   :  { %v2609_v43 = vmul.f32 %v2601_v15, %v2590_v40  ;;  %vm2600_vm14 = vcmp.ge.f32.partialorder %v2590_v40, 0.0 }
0x2987   :  { %vm2599_vm15 = vcmp.ge.f32.partialorder %v2585_v42, 0.0  ;;  %v2608_v45 = vmul.f32 %v2601_v15, %v2585_v42 }
0x2988   :  { %v2617_v49 = vsel %vm2600_vm14, %v2590_v40, %v2609_v43 }
0x2989   :  { %v2616_v47 = vsel %vm2599_vm15, %v2585_v42, %v2608_v45  ;;  %v2978_v45 = vpop.permute.xlu1 %2977 }
0x298a   :  { %3449 = vmatprep.mubr.msk.f32.mxu0 %vm310_vm3, %v2616_v47 }
0x298b   :  { %3450 = vmatmul.mubr.msk.f32.gmra.mrb[46].mxu0 %vm310_vm3, %v2617_v49 }
0x29eb   :  { %v3442_v56 = vpop.f32.mrb[40].mxu0 }
0x29ec   :  { %v2719_v59 = vadd.f32 %v3442_v56, %v2622_v53  ;;  %v2713_v31 = vpop.f32.mrb[41].mxu0 }
0x29ed   :  { %v2714_v60 = vadd.f32 %v2713_v31, %v2622_v53 }
0x29ee   :  { %v2762_v61 = vmul.f32 %v2760_v58, %v2719_v59  ;;  %vm2753_vm0 = vcmp.ge.f32.partialorder %v2719_v59, 0.0 }
0x29ef   :  { %vm2752_vm2 = vcmp.ge.f32.partialorder %v2714_v60, 0.0  ;;  %v2761_v12 = vmul.f32 %v2760_v58, %v2714_v60  ;;  %v3445_v62 = vpop.f32.mrb[42].mxu0 }
0x29f0   :  { %v2729_v29 = vadd.f32 %v3445_v62, %v2622_v53  ;;  %v2723_v52 = vpop.f32.mrb[43].mxu0  ;;  %v2770_v51 = vsel %vm2753_vm0, %v2719_v59, %v2762_v61 }
0x29f1   :  { %v2724_v63 = vadd.f32 %v2723_v52, %v2622_v53  ;;  %v2769_v0 = vsel %vm2752_vm2, %v2714_v60, %v2761_v12  ;;  %v2982_v60 = vpop.permute.xlu1 %2981 }
0x29f2   :  { %v2764_v6 = vmul.f32 %v2760_v58, %v2729_v29  ;;  %3460 = vmatprep.mubr.msk.f32.mxu1 %vm310_vm3, %v2769_v0  ;;  %vm2755_vm4 = vcmp.ge.f32.partialorder %v2729_v29, 0.0 }
0x29f3   :  { %vm2754_vm5 = vcmp.ge.f32.partialorder %v2724_v63, 0.0  ;;  %v2763_v7 = vmul.f32 %v2760_v58, %v2724_v63  ;;  %v3448_v27 = vpop.f32.mrb[44].mxu0  ;;  %3461 = vmatmul.mubr.msk.f32.vlgmr.msra.gmra.mrb[32].mxu1 %vm310_vm3, %v2770_v51 }
0x29f4   :  { %v2739_v57 = vadd.f32 %v3448_v27, %v2622_v53  ;;  %v2733_v2 = vpop.f32.mrb[45].mxu0  ;;  %v2772_v13 = vsel %vm2755_vm4, %v2729_v29, %v2764_v6 }
0x29f5   :  { %v2734_v5 = vadd.f32 %v2733_v2, %v2622_v53  ;;  %v2771_v3 = vsel %vm2754_vm5, %v2724_v63, %v2763_v7  ;;  %v2994_v0 = vpop.permute.xlu1 %2993 }
0x29f6   :  { %v2766_v35 = vmul.f32 %v2760_v58, %v2739_v57  ;;  %3463 = vmatprep.mubr.msk.f32.mxu1 %vm310_vm3, %v2771_v3  ;;  %vm2757_vm6 = vcmp.ge.f32.partialorder %v2739_v57, 0.0 }
0x29f7   :  { %vm2756_vm7 = vcmp.ge.f32.partialorder %v2734_v5, 0.0  ;;  %v2765_v4 = vmul.f32 %v2760_v58, %v2734_v5  ;;  %3464 = vmatmul.mubr.msk.f32.gmra.mrb[34].mxu1 %vm310_vm3, %v2772_v13 }
0x29f8   :  { %v2774_v10 = vsel %vm2757_vm6, %v2739_v57, %v2766_v35 }
0x29f9   :  { %v2773_v11 = vsel %vm2756_vm7, %v2734_v5, %v2765_v4 }
0x29fa   :  { %3466 = vmatprep.mubr.msk.f32.mxu1 %vm310_vm3, %v2773_v11 }
0x29fb   :  { %3467 = vmatmul.mubr.msk.f32.gmra.mrb[36].mxu1 %vm310_vm3, %v2774_v10 }
0x2a5e   :  { %v3451_v15 = vpop.f32.mrb[46].mxu0 }
0x2a5f   :  { %v2749_v19 = vadd.f32 %v3451_v15, %v2622_v53  ;;  %v2743_v20 = vpop.f32.mrb[47].mxu0 }
0x2a60   :  { %v2744_v16 = vadd.f32 %v2743_v20, %v2622_v53 }
0x2a61   :  { %v2768_v21 = vmul.f32 %v2760_v58, %v2749_v19  ;;  %vm2759_vm8 = vcmp.ge.f32.partialorder %v2749_v19, 0.0 }
0x2a62   :  { %vm2758_vm9 = vcmp.ge.f32.partialorder %v2744_v16, 0.0  ;;  %v2767_v22 = vmul.f32 %v2760_v58, %v2744_v16  ;;  %v4591_v58 = vpop.permute.xlu0 %2979 }
0x2a63   :  { %v2776_v48 = vsel %vm2759_vm8, %v2749_v19, %v2768_v21 }
0x2a64   :  { %v2775_v44 = vsel %vm2758_vm9, %v2744_v16, %v2767_v22 }
0x2a65   :  { %3469 = vmatprep.mubr.msk.f32.mxu1 %vm310_vm3, %v2775_v44 }
0x2a66   :  { %3470 = vmatmul.mubr.msk.f32.gmra.mrb[38].mxu1 %vm310_vm3, %v2776_v48  ;;  %v2992_v29 = vpop.permute.xlu0 %2991  ;;  %vm3008_vm3 = vcmask 162816  }
0x2a6a   :  { %v2996_v2 = vpop.permute.xlu0 %2995 }
0x2ac6   :  { %v3462_v18 = vpop.f32.mrb[32].mxu1 }
0x2ac7   :  { %v2878_v8 = vadd.f32 %v3462_v18, %v4583_v54  ;;  %v2872_v1 = vpop.f32.mrb[33].mxu1 }
0x2ac8   :  { %v2873_v23 = vadd.f32 %v2872_v1, %v4583_v54 }
0x2ac9   :  { %v3131_v14 = vmul.f32 -1.442695, %v2878_v8 }
0x2aca   :  { %v3130_v26 = vmul.f32 -1.442695, %v2873_v23  ;;  %v3465_v17 = vpop.f32.mrb[34].mxu1 }
0x2acb   :  { %3810 = vpow2.f32 %v3131_v14  ;;  %v2888_v25 = vadd.f32 %v3465_v17, %v4583_v54  ;;  %v2882_v46 = vpop.f32.mrb[35].mxu1 }
0x2acc   :  { %3812 = vpow2.f32 %v3130_v26  ;;  %v2883_v50 = vadd.f32 %v2882_v46, %v4583_v54 }
0x2acd   :  { %v3133_v55 = vmul.f32 -1.442695, %v2888_v25 }
0x2ace   :  { %v3132_v28 = vmul.f32 -1.442695, %v2883_v50  ;;  %v3468_v30 = vpop.f32.mrb[36].mxu1 }
0x2acf   :  { %3814 = vpow2.f32 %v3133_v55  ;;  %v2898_v33 = vadd.f32 %v3468_v30, %v4583_v54  ;;  %v2892_v34 = vpop.f32.mrb[37].mxu1 }
0x2ad0   :  { %3816 = vpow2.f32 %v3132_v28  ;;  %v2893_v36 = vadd.f32 %v2892_v34, %v4583_v54 }
0x2ad1   :  { %v3135_v38 = vmul.f32 -1.442695, %v2898_v33 }
0x2ad2   :  { %v3134_v39 = vmul.f32 -1.442695, %v2893_v36 }
0x2ad3   :  { %3818 = vpow2.f32 %v3135_v38 }
0x2ad4   :  { %3820 = vpow2.f32 %v3134_v39 }
0x2ad5   :  { %v3811_v40 = vpop.eup %3810 }
0x2ad6   :  { %v3813_v42 = vpop.eup %3812  ;;  %v2936_v43 = vadd.f32 1.0, %v3811_v40 }
0x2ad7   :  { %v2935_v47 = vadd.f32 1.0, %v3813_v42 }
0x2ad8   :  { %3822 = vrcp.f32 %v2936_v43 }
0x2ad9   :  { %v3815_v49 = vpop.eup %3814  ;;  %3824 = vrcp.f32 %v2935_v47 }
0x2ada   :  { %v3817_v53 = vpop.eup %3816  ;;  %v2938_v56 = vadd.f32 1.0, %v3815_v49 }
0x2adb   :  { %v2937_v59 = vadd.f32 1.0, %v3817_v53 }
0x2adc   :  { %3826 = vrcp.f32 %v2938_v56 }
0x2add   :  { %v3819_v31 = vpop.eup %3818  ;;  %3828 = vrcp.f32 %v2937_v59 }
0x2ade   :  { %v3821_v61 = vpop.eup %3820  ;;  %v2940_v12 = vadd.f32 1.0, %v3819_v31 }
0x2adf   :  { %v2939_v62 = vadd.f32 1.0, %v3821_v61 }
0x2ae0   :  { %3830 = vrcp.f32 %v2940_v12 }
0x2ae1   :  { %3832 = vrcp.f32 %v2939_v62 }
0x2ae2   :  { %v3823_v52 = vpop.eup %3822 }
0x2ae3   :  { %v3825_v63 = vpop.eup %3824  ;;  %v3001_v51 = vsel %vm67_vm1, %v3823_v52, %v2970_v24 }
0x2ae4   :  { %v3000_v6 = vsel %vm67_vm1, %v3825_v63, %v2968_v9  ;;  %v3010_v7 = vsel %vm3008_vm3, %v3001_v51, %v2994_v0 }
0x2ae5   :  { %v3009_v27 = vsel %vm3008_vm3, %v3000_v6, %v2992_v29  ;;  %v3019_v57 = vsel %vm3017_vm10, %v3010_v7, 0.0 }
0x2ae6   :  { %v3827_v5 = vpop.eup %3826  ;;  %v3018_v3 = vsel %vm3017_vm10, %v3009_v27, 0.0  ;;  %3027 = vst [vmem:[%s4648_s4 + $0x8] sm:$0xff] %v3019_v57 }
0x2ae7   :  { %v3829_v35 = vpop.eup %3828  ;;  %v3003_v13 = vsel %vm67_vm1, %v3827_v5, %v2974_v37  ;;  %3026 = vst [vmem:[%s4648_s4] sm:$0xff] %v3018_v3 }
0x2ae8   :  { %v3002_v4 = vsel %vm67_vm1, %v3829_v35, %v2972_v32  ;;  %v3012_v11 = vsel %vm3008_vm3, %v3003_v13, %v2996_v2 }
0x2ae9   :  { %v3011_v10 = vsel %vm3008_vm3, %v3002_v4, %v2996_v2  ;;  %v3021_v15 = vsel %vm3017_vm10, %v3012_v11, 0.0 }
0x2aea   :  { %v3831_v19 = vpop.eup %3830  ;;  %v3020_v20 = vsel %vm3017_vm10, %v3011_v10, 0.0  ;;  %3029 = vst [vmem:[%s4648_s4 + $0x18] sm:$0xff] %v3021_v15 }
0x2aeb   :  { %v3833_v16 = vpop.eup %3832  ;;  %v3005_v21 = vsel %vm67_vm1, %v3831_v19, %v2978_v45  ;;  %3028 = vst [vmem:[%s4648_s4 + $0x10] sm:$0xff] %v3020_v20 }
0x2aec   :  { %v3004_v22 = vsel %vm67_vm1, %v3833_v16, %v2976_v41  ;;  %v3014_v44 = vsel %vm3008_vm3, %v3005_v21, %v2996_v2 }
0x2aed   :  { %v3013_v48 = vsel %vm3008_vm3, %v3004_v22, %v2996_v2  ;;  %v3023_v18 = vsel %vm3017_vm10, %v3014_v44, 0.0 }
0x2aee   :  { %v3022_v8 = vsel %vm3017_vm10, %v3013_v48, 0.0  ;;  %3031 = vst [vmem:[%s4648_s4 + $0x28] sm:$0xff] %v3023_v18 }
0x2aef   :  { %3030 = vst [vmem:[%s4648_s4 + $0x20] sm:$0xff] %v3022_v8 }
0x2b39   :  { %v3471_v1 = vpop.f32.mrb[38].mxu1 }
0x2b3a   :  { %v2908_v23 = vadd.f32 %v3471_v1, %v4583_v54  ;;  %v2902_v9 = vpop.f32.mrb[39].mxu1 }
0x2b3b   :  { %v2903_v14 = vadd.f32 %v2902_v9, %v4583_v54 }
0x2b3c   :  { %v3137_v26 = vmul.f32 -1.442695, %v2908_v23 }
0x2b3d   :  { %v3136_v17 = vmul.f32 -1.442695, %v2903_v14 }
0x2b3e   :  { %3834 = vpow2.f32 %v3137_v26 }
0x2b3f   :  { %3836 = vpow2.f32 %v3136_v17 }
0x2b48   :  { %v3835_v24 = vpop.eup %3834 }
0x2b49   :  { %v3837_v25 = vpop.eup %3836  ;;  %v2942_v46 = vadd.f32 1.0, %v3835_v24 }
0x2b4a   :  { %v2941_v50 = vadd.f32 1.0, %v3837_v25 }
0x2b4b   :  { %3838 = vrcp.f32 %v2942_v46 }
0x2b4c   :  { %3840 = vrcp.f32 %v2941_v50 }
0x2b55   :  { %v3839_v55 = vpop.eup %3838 }
0x2b56   :  { %v3841_v28 = vpop.eup %3840  ;;  %v3007_v30 = vsel %vm67_vm1, %v3839_v55, %v2982_v60 }
0x2b57   :  { %v3016_v32 = vsel %vm3008_vm3, %v3007_v30, %v2996_v2  ;;  %v3006_v33 = vsel %vm67_vm1, %v3841_v28, %v4591_v58 }
0x2b58   :  { %v3025_v54 = vsel %vm3017_vm10, %v3016_v32, 0.0  ;;  %v3015_v34 = vsel %vm3008_vm3, %v3006_v33, %v2996_v2 }
0x2b59   :  { %3033 = vst [vmem:[%s4648_s4 + $0x38] sm:$0xff] %v3025_v54  ;;  %v3024_v36 = vsel %vm3017_vm10, %v3015_v34, 0.0 }
0x2b5a   :  { %3032 = vst [vmem:[%s4648_s4 + $0x30] sm:$0xff] %v3024_v36 }
0x2b5b   :  { %3038 = vsyncpa [#allocation3], 1 }

</bundles_post_ra>
